<compile_context>
chip_gen: v5e
topology: v5e:2x2
jax: 0.10.0
libtpu: 0.0.40
codegen_flags: <defaults>
</compile_context>

<pallas_src>
import jax
import jax.numpy as jnp
from jax.experimental import pallas as pl
from jax.experimental.pallas import tpu as pltpu

LANE = 128                    # vreg lane width: last dim of the slab
MIN_PALLAS_N = 256 * 1024     # below ~1 MiB of data, fused XLA is already at roofline


def _detect_tile_r_max() -> int:
    """Rows per grid step: 1 MiB f32 tiles on v5e/v6e, 4 MiB on v7x."""
    try:
        kind = jax.devices()[0].device_kind.lower()
    except Exception:  # pragma: no cover - no device at import time
        kind = ""
    # v7x HBM is ~3.2 TB/s per TC, so tiles must be ~4x bigger to keep the
    # DMA time above the fixed per-grid-step overhead.
    return 8192 if "v7" in kind else 2048


TILE_R_MAX = _detect_tile_r_max()


def _round_up(a: int, m: int) -> int:
    return (a + m - 1) // m * m


def _sublane_multiple(dtype) -> int:
    # Minimum second-minor block multiple per dtype packing (f32:8, bf16:16, int8/fp8:32).
    return {4: 8, 2: 16, 1: 32}.get(jnp.dtype(dtype).itemsize, 8)


def _affine_kernel(w_ref, b_ref, x_ref, o_ref):
    # w_ref, b_ref: (1, 1) f32 scalars in SMEM
    # x_ref, o_ref: (tile_r, 128) lane-dense tiles in VMEM
    w = w_ref[0, 0]
    b = b_ref[0, 0]
    o_ref[...] = (x_ref[...].astype(jnp.float32) * w + b).astype(o_ref.dtype)


def _xla_affine(x, w, b, out_dtype):
    return (x.astype(jnp.float32) * w + b).astype(out_dtype)


@jax.jit
def linear_regression_forward(x, weight, bias):
    """y = x @ weight.T + bias, with weight (1, 1) and bias (1,)."""
    n, f = x.shape
    assert f == 1, "LinearRegression expects in_features == 1"
    out_dtype = x.dtype

    w = weight.reshape(()).astype(jnp.float32)
    b = bias.reshape(()).astype(jnp.float32)

    rows_all = n // LANE
    # Tiny-batch fast path: let XLA fuse the scalar affine (launch overhead dominates).
    if n < MIN_PALLAS_N or rows_all == 0:
        return _xla_affine(x, w, b, out_dtype)

    sub = _sublane_multiple(out_dtype)
    # Aim for >= 2 grid steps (v7x megacore split), capped at TILE_R_MAX rows.
    tile_r = max(sub, min(TILE_R_MAX, _round_up(pl.cdiv(rows_all, 2), sub)))
    grid = (pl.cdiv(rows_all, tile_r),)   # partial last block is masked by Pallas

    # Lane-dense prefix: first rows_all*128 elements as a (rows, 128) slab.
    # When n % 128 == 0 (the common case) this is a pure bitcast view.
    n_main = rows_all * LANE
    flat = x.reshape(n)
    slab = flat[:n_main].reshape(rows_all, LANE)

    w_smem = w.reshape(1, 1)
    b_smem = b.reshape(1, 1)

    out_slab = pl.pallas_call(
        _affine_kernel,
        out_shape=jax.ShapeDtypeStruct((rows_all, LANE), out_dtype),
        grid=grid,
        in_specs=[
            pl.BlockSpec(memory_space=pltpu.MemorySpace.SMEM),   # weight scalar
            pl.BlockSpec(memory_space=pltpu.MemorySpace.SMEM),   # bias scalar
            pl.BlockSpec((tile_r, LANE), lambda i: (i, 0)),      # x tile
        ],
        out_specs=pl.BlockSpec((tile_r, LANE), lambda i: (i, 0)),
        compiler_params=pltpu.CompilerParams(
            dimension_semantics=("parallel",),        # split grid across TCs on v7x
            vmem_limit_bytes=32 * 1024 * 1024,        # covers 4 MiB tiles double-buffered
        ),
    )(w_smem, b_smem, slab)

    y_main = out_slab.reshape(n_main, 1)
    if n_main == n:
        return y_main

    # Ragged tail (< 128 elements): fused XLA affine, assembled once.
    y_tail = _xla_affine(flat[n_main:].reshape(n - n_main, 1), w, b, out_dtype)
    return jnp.concatenate([y_main, y_tail], axis=0)


if __name__ == "__main__":
    key = jax.random.PRNGKey(0)
    kx1, kx2, kw, kb = jax.random.split(key, 4)

    # nn.Linear(1, 1) parameters: weight (1, 1), bias (1,).
    weight = jax.random.uniform(kw, (1, 1), jnp.float32, -1.0, 1.0)
    bias = jax.random.uniform(kb, (1,), jnp.float32, -1.0, 1.0)

    # Case 1: large, 128-aligned, rows not a multiple of tile_r
    #         -> Pallas path, multi-step grid, partial (masked) last block.
    n1 = 5000 * LANE
    x1 = jax.random.normal(kx1, (n1, 1), jnp.float32)
    y1 = linear_regression_forward(x1, weight, bias)
    jax.block_until_ready(y1)
    ref1 = x1 @ weight.T + bias
    assert y1.shape == (n1, 1)
    assert jnp.allclose(y1, ref1, atol=1e-5, rtol=1e-5), "mismatch (aligned large batch)"

    # Case 2: ragged N (not a multiple of 128) -> Pallas prefix + XLA tail + concat.
    n2 = 4096 * LANE + 77
    x2 = jax.random.normal(kx2, (n2, 1), jnp.float32)
    y2 = linear_regression_forward(x2, weight, bias)
    jax.block_until_ready(y2)
    ref2 = x2 @ weight.T + bias
    assert y2.shape == (n2, 1)
    assert jnp.allclose(y2, ref2, atol=1e-5, rtol=1e-5), "mismatch (ragged batch)"

    # Case 3: tiny batch (original demo scale) -> XLA fallback path.
    x3 = x1[:8]
    y3 = linear_regression_forward(x3, weight, bias)
    jax.block_until_ready(y3)
    ref3 = x3 @ weight.T + bias
    assert jnp.allclose(y3, ref3, atol=1e-5, rtol=1e-5), "mismatch (tiny batch)"

    print("KERNEL_OK")
</pallas_src>

<mosaic_0001>
module attributes {stable_mosaic.version = 11 : i64} {
  func.func @_affine_kernel(%arg0: i32, %arg1: memref<1x1xf32, #tpu.memory_space<smem>>, %arg2: memref<1x1xf32, #tpu.memory_space<smem>>, %arg3: memref<2048x128xf32, #tpu.memory_space<vmem>>, %arg4: memref<2048x128xf32, #tpu.memory_space<vmem>>) attributes {dimension_semantics = [#tpu.dimension_semantics<parallel>], iteration_bounds = array<i64: 3>, scalar_prefetch = 0 : i64, scratch_operands = 0 : i64, tpu.core_type = #tpu.core_type<tc>, window_params = [{transform_indices = @transform_0, window_bounds = array<i64: 1, 1>}, {transform_indices = @transform_1, window_bounds = array<i64: 1, 1>}, {transform_indices = @transform_2, window_bounds = array<i64: 2048, 128>}, {transform_indices = @transform_3, window_bounds = array<i64: 2048, 128>}]} {
    %c0 = arith.constant 0 : index
    %c0_0 = arith.constant 0 : index
    %0 = memref.load %arg1[%c0, %c0_0] : memref<1x1xf32, #tpu.memory_space<smem>>
    %c0_1 = arith.constant 0 : index
    %c0_2 = arith.constant 0 : index
    %1 = memref.load %arg2[%c0_1, %c0_2] : memref<1x1xf32, #tpu.memory_space<smem>>
    %c0_3 = arith.constant 0 : index
    %c0_4 = arith.constant 0 : index
    %2 = vector.load %arg3[%c0_3, %c0_4] : memref<2048x128xf32, #tpu.memory_space<vmem>>, vector<2048x128xf32>
    %3 = vector.broadcast %0 : f32 to vector<2048x128xf32>
    %4 = arith.mulf %2, %3 : vector<2048x128xf32>
    %5 = vector.broadcast %1 : f32 to vector<2048x128xf32>
    %6 = arith.addf %4, %5 : vector<2048x128xf32>
    %c0_5 = arith.constant 0 : index
    %c0_6 = arith.constant 0 : index
    %7 = vector.load %arg4[%c0_5, %c0_6] : memref<2048x128xf32, #tpu.memory_space<vmem>>, vector<2048x128xf32>
    tpu.vector_store %arg4[%c0_5, %c0_6], %6 {strides = array<i32>} : memref<2048x128xf32, #tpu.memory_space<vmem>>, vector<2048x128xf32>,
    return
  }
  func.func @transform_0(%arg0: i32) -> (i32, i32) {
    %c0_i32 = arith.constant 0 : i32
    %c0_i32_0 = arith.constant 0 : i32
    %c0_i32_1 = arith.constant 0 : i32
    return %c0_i32, %c0_i32_0 : i32, i32
  }
  func.func @transform_1(%arg0: i32) -> (i32, i32) {
    %c0_i32 = arith.constant 0 : i32
    %c0_i32_0 = arith.constant 0 : i32
    %c0_i32_1 = arith.constant 0 : i32
    return %c0_i32, %c0_i32_0 : i32, i32
  }
  func.func @transform_2(%arg0: i32) -> (i32, i32) {
    %c0_i32 = arith.constant 0 : i32
    %c0_i32_0 = arith.constant 0 : i32
    return %arg0, %c0_i32 : i32, i32
  }
  func.func @transform_3(%arg0: i32) -> (i32, i32) {
    %c0_i32 = arith.constant 0 : i32
    %c0_i32_0 = arith.constant 0 : i32
    return %arg0, %c0_i32 : i32, i32
  }
}

</mosaic_0001>

<bundles_post_ra>
// kernel: linear_regression_forward.1
= control target key start
LH: loop header
LB: loop body
LE: loop exit
PB: predicated region body
PF: predicated region fallthrough
CT: control target
= control target key end

     0   :  { %s2758_s0 = inlined_call_operand.<no memory space> [shape: f32[1,1], index: 0, kind: input, shape index: {}]   ;;  %s2759_s1 = inlined_call_operand.<no memory space> [shape: f32[1,1], index: 1, kind: input, shape index: {}]   ;;  %s2760_s2 = inlined_call_operand.hbm [shape: f32[5000,128], index: 2, kind: input, shape index: {}]   ;;  %s2761_s3 = inlined_call_operand.hbm [shape: f32[5000,128], index: 3, kind: output, shape index: {}]  }
   0x1   :  { %8 = sst [smem:[#allocation2]] %s2758_s0 }
   0x2   :  { %9 = sst [smem:[#allocation3]] %s2759_s1 }
   0x3   :  { %10 = vsyncpa [#allocation5], 0 }
   0x4   :  { %12 = vsyncpa [#allocation5 + $0x1], 0 }
   0x5   :  { %13 = vsyncpa [#allocation6], 0 }
   0x6   :  { %15 = vsyncpa [#allocation6 + $0x1], 0  ;;  %s1551_s16 = smov 0   ;;  %s1553_s17 = smov 0  }
   0x7   :  { %s1555_s18 = smov 0   ;;  %s1557_s19 = smov 0  }
   0x8 LB: > { %s1572_s0 = sadd.s32 4294967295, %s1517_s19   ;;  %s1334_s1 = sadd.s32 4294967294, %s1517_s19   ;;  %s1517_s19 = sphi %s1557_s19, %s2770_s19   ;;  %s1513_s18 = sphi %s1555_s18, %s2769_s18   ;;  %s1509_s17 = sphi %s1553_s17, %s2768_s17   ;;  %s1505_s16 = sphi %s1551_s16, %s2767_s16  }
   0x9   : > { %s1576_s20 = sadd.s32 1, %s1517_s19   ;;  %s70_s21 = sadd.s32 1, %s1513_s18 }
   0xa   : > { %s67_s22 = ssub.s32 %s1517_s19, %s1576_s20  ;;  %p77_p0 = scmp.ne.s32.totalorder %s1513_s18, %s1509_s17 }
   0xb   : > { %p68_p1 = scmp.eq.s32.totalorder %s67_s22, 0  ;;  %p78_p2 = scmp.eq.s32.totalorder %s1517_s19, 0 }
   0xc   : > { %p83_p3 = scmp.ne.s32.totalorder %s1509_s17, %s1505_s16  ;;  %p84_p4 = scmp.eq.s32.totalorder %s1572_s0, 0 }
   0xd   : > { %s1588_s23 = scalar_select %p68_p1, %s1513_s18, %s70_s21  }
   0xe   : > { %p79_p5 = por %p78_p2, %p77_p0  ;;  %p1590_p6 = por %p84_p4, %p83_p3 }
   0xf   : > { %p107_p7 = scmp.eq.s32.totalorder %s1572_s0, 2  ;;  %p113_p8 = scmp.eq.s32.totalorder %s1334_s1, 2 }
  0x10   : > { %p1336_p11 = scmp.ge.s32.totalorder %s1517_s19, 3 }
  0x11   : > { %p1595_p9 = por %p107_p7, %p77_p0  ;;  %p1599_p10 = por %p113_p8, %p83_p3 }
  0x12   : > { %135 = sbr.rel (%p1336_p11) target bundleno = 59 (0x3b), region = 24 }
  0x17   : > { %138 = sbr.rel (!%p79_p5) target bundleno = 59 (0x3b), region = 28  ;;  %s139_s27 = sand.u32 (%p79_p5), 1, %s1513_s18  }
  0x18   : > { %s1338_s28 = sshll.u32 (%p79_p5), %s1517_s19, 8  ;;  %s1337_s29 = sshll.u32 (%p79_p5), %s139_s27, 11 }
  0x19   : > { %s145_s30 = ssub.s32 (%p79_p5), 625, %s1338_s28  ;;  %s1609_s7 = scalar_lea.sflag (%p79_p5), [#allocation5], %s139_s27 }
  0x1a   : > { %p146_p12 = scmp.lt.s32.totalorder (%p79_p5), %s145_s30, 256  ;;  %s143_s8 = scalar_lea.vmem (%p79_p5), [#allocation4], %s1337_s29 }
  0x1c   : > { %s2772_s30 = smov (!%p146_p12, %s145_s30), 256 }
  0x1d   : > { %s1339_s4 = sshll.u32 %s2772_s30, 3 }
  0x1e   : > { %s149_s5 = ssub.s32 2048, %s1339_s4 }
  0x1f   : > { %s150_s6 = sshll.u32 %s149_s5, 4 }
  0x20   : > { %151 = vsyncadd %s1609_s7, %s150_s6  ;;  %p1612_p13 = scmp.ne.s32.totalorder %s1339_s4, 0  ;;  %s1356_s10 = sshll.u32 %s1517_s19, 11 }
  0x21   : > { %s154_s13 = scalar_lea.hbm %s2760_s2, %s1356_s10  ;;  %s1620_s14 = sshll.u32 %s143_s8, 4  ;;  %s159_s14 = int_to_ptr.vmem [resolvable:$true] %s1620_s14 }
  0x22   : > { %s156_s15 = sshll.u32 %s154_s13, 4  ;;  %s1343_s1 = sshll.u32 %s2772_s30, 7  ;;  %s1623_s15 = int_to_ptr.hbm [resolvable:$true] %s156_s15 }
  0x23   : > { %s1401_s21 = sshra.s32 %s1623_s15, 4  ;;  %s1403_s22 = sshrl.u32 %s1343_s1, 4  ;;  %s1402_s21 = int_to_ptr.hbm [resolvable:$true] %s1401_s21 }
  0x24   : > { %s1408_s27 = scalar_lea.hbm %s1402_s21, %s1403_s22  ;;  %s1412_s4 = scalar_lea.hbm %s2760_s2, 5000 }
  0x25   : > { %p1409_p0 = scmp.ne.s32.totalorder %s1402_s21, %s1408_s27  ;;  %p1413_p3 = scmp.lt.s32.totalorder %s1402_s21, %s2760_s2 }
  0x26   : > { %p1414_p4 = scmp.lt.s32.totalorder %s1412_s4, %s1408_s27 }
  0x27   : > { %p1410_p1 = pnand %p1409_p0, %p1612_p13 }
  0x28   : > { %p1415_p5 = por %p1414_p4, %p1413_p3 }
  0x29   : > { %p1411_p2 = pneg %p1410_p1 }
  0x2b   : > { %p1416_p7 = pnand %p1415_p5, %p1411_p2 }
  0x2d   : > { %1419 = shalt.err (!%p1416_p7)
}
  0x2e   : > { %s1420_s8 = sshra.s32 %s159_s14, 4  ;;  %s1519_s11 = smov [#allocation4]   ;;  %s1421_s8 = int_to_ptr.vmem [resolvable:$true] %s1420_s8 }
  0x2f   : > { %s1427_s10 = scalar_lea.vmem %s1421_s8, %s1403_s22  ;;  %s1431_s12 = scalar_lea.vmem %s1519_s11, 4096 }
  0x30   : > { %p1428_p8 = scmp.ne.s32.totalorder %s1421_s8, %s1427_s10  ;;  %p1433_p0 = scmp.lt.s32.totalorder %s1431_s12, %s1427_s10 }
  0x32   : > { %p1429_p11 = pnand %p1428_p8, %p1612_p13 }
  0x34   : > { %p1430_p12 = pneg %p1429_p11 }
  0x36   : > { %p1435_p1 = pnand %p1433_p0, %p1430_p12 }
  0x38   : > { %1438 = shalt.err (!%p1435_p1)
}
  0x39   : > { %s1520_s13 = smov 128   ;;  %s1521_s21 = smov 8  }
  0x3a   : > { %164 = dma.hbm_to_vmem [thread:$0]  (%p1612_p13), %s1623_s15, %s1343_s1, %s159_s14, %s1609_s7, %s1520_s13, %s1520_s13, %s1521_s21  }
  0x3b PF: > { %p1344_p2 = scmp.ge.s32.totalorder %s1517_s19, 1  ;;  %p166_p3 = scmp.lt.s32.totalorder %s1517_s19, 4 }
  0x3d   : > { %p167_p4 = pnand %p1344_p2, %p166_p3 }
  0x3e   : > { %s1652_s22 = sand.u32 (!%p167_p4), 1, %s1509_s17  }
  0x3f   : > { %170 = sbr.rel (%p167_p4) target bundleno = 367 (0x16f), region = 32  ;;  %s1345_s27 = sshll.u32 (!%p167_p4), %s1652_s22, 11 }
  0x40   : > { %s173_s9 = scalar_lea.sflag (!%p167_p4), [#allocation5], %s1652_s22  ;;  %s1658_s30 = scalar_lea.vmem (!%p167_p4), [#allocation4], %s1345_s27 }
  0x44   : > { %1496 = dma.done.wait (%p1590_p6), %s173_s9, 32768  }
  0x45   : > { %1498 = vsyncadd (%p1590_p6), %s173_s9, 4294934528  ;;  %s210_s7 = sld [smem:[#allocation2]]  ;;  %v212_v0 = vld [vmem:[%s1658_s30] sm:$0xff]  ;;  %v213_v2 = vld [vmem:[%s1658_s30 + $0x8] sm:$0xff]  ;;  %s1693_s24 = scalar_lea.vmem [#allocation7], %s1345_s27 }
  0x46   : > { %s211_s14 = sld [smem:[#allocation3]]  ;;  %v214_v3 = vld [vmem:[%s1658_s30 + $0x10] sm:$0xff]  ;;  %v215_v8 = vld [vmem:[%s1658_s30 + $0x18] sm:$0xff]  ;;  %v216_v9 = vld [vmem:[%s1658_s30 + $0x20] sm:$0xff]  ;;  %s1239_s15 = scalar_lea.sflag [#allocation6], %s1652_s22 }
  0x47   : > { %v217_v10 = vld [vmem:[%s1658_s30 + $0x28] sm:$0xff]  ;;  %v218_v14 = vld [vmem:[%s1658_s30 + $0x30] sm:$0xff]  ;;  %v219_v15 = vld [vmem:[%s1658_s30 + $0x38] sm:$0xff]  ;;  %s1348_s1 = sshll.u32 (%p1595_p9), %s1572_s0, 8 }
  0x48   : > { %v220_v16 = vld [vmem:[%s1658_s30 + $0x40] sm:$0xff]  ;;  %v221_v21 = vld [vmem:[%s1658_s30 + $0x48] sm:$0xff]  ;;  %v222_v24 = vld [vmem:[%s1658_s30 + $0x50] sm:$0xff]  ;;  %s1247_s28 = ssub.s32 (%p1595_p9), 625, %s1348_s1 }
  0x49   : > { %v223_v27 = vld [vmem:[%s1658_s30 + $0x58] sm:$0xff]  ;;  %v224_v30 = vld [vmem:[%s1658_s30 + $0x60] sm:$0xff]  ;;  %v225_v33 = vld [vmem:[%s1658_s30 + $0x68] sm:$0xff]  ;;  %p1248_p6 = scmp.lt.s32.totalorder (%p1595_p9), %s1247_s28, 256 }
  0x4a   : > { %v226_v36 = vld [vmem:[%s1658_s30 + $0x70] sm:$0xff]  ;;  %v227_v39 = vld [vmem:[%s1658_s30 + $0x78] sm:$0xff]  ;;  %v228_v42 = vld [vmem:[%s1658_s30 + $0x80] sm:$0xff] }
  0x4b   : > { %v1665_v1 = vstv %s210_s7  ;;  %v229_v45 = vld [vmem:[%s1658_s30 + $0x88] sm:$0xff]  ;;  %v230_v48 = vld [vmem:[%s1658_s30 + $0x90] sm:$0xff]  ;;  %v231_v51 = vld [vmem:[%s1658_s30 + $0x98] sm:$0xff] }
  0x4c   : > { %v469_v4 = vmul.f32 %v1665_v1, %v212_v0  ;;  %v1670_v5 = vstv %s211_s14  ;;  %v470_v6 = vmul.f32 %v1665_v1, %v213_v2  ;;  %v471_v7 = vmul.f32 %v1665_v1, %v214_v3  ;;  %v232_v54 = vld [vmem:[%s1658_s30 + $0xa0] sm:$0xff]  ;;  %v233_v57 = vld [vmem:[%s1658_s30 + $0xa8] sm:$0xff]  ;;  %v234_v60 = vld [vmem:[%s1658_s30 + $0xb0] sm:$0xff] }
  0x4d   : > { %v472_v11 = vmul.f32 %v1665_v1, %v215_v8  ;;  %v473_v12 = vmul.f32 %v1665_v1, %v216_v9  ;;  %v474_v13 = vmul.f32 %v1665_v1, %v217_v10  ;;  %v475_v20 = vmul.f32 %v1665_v1, %v218_v14  ;;  %v235_v63 = vld [vmem:[%s1658_s30 + $0xb8] sm:$0xff]  ;;  %v236_v3 = vld [vmem:[%s1658_s30 + $0xc0] sm:$0xff]  ;;  %v238_v10 = vld [vmem:[%s1658_s30 + $0xd0] sm:$0xff] }
  0x4e   : > { %v726_v17 = vadd.f32 %v1670_v5, %v469_v4  ;;  %v727_v18 = vadd.f32 %v1670_v5, %v470_v6  ;;  %v728_v19 = vadd.f32 %v1670_v5, %v471_v7  ;;  %v476_v23 = vmul.f32 %v1665_v1, %v219_v15  ;;  %v237_v7 = vld [vmem:[%s1658_s30 + $0xc8] sm:$0xff] }
  0x4f   : > { %v729_v22 = vadd.f32 %v1670_v5, %v472_v11  ;;  %v730_v25 = vadd.f32 %v1670_v5, %v473_v12  ;;  %v477_v26 = vmul.f32 %v1665_v1, %v220_v16  ;;  %v731_v28 = vadd.f32 %v1670_v5, %v474_v13  ;;  %v239_v13 = vld [vmem:[%s1658_s30 + $0xd8] sm:$0xff]  ;;  %v240_v16 = vld [vmem:[%s1658_s30 + $0xe0] sm:$0xff] }
  0x50   : > { %982 = vst [vmem:[%s1693_s24] sm:$0xff] %v726_v17  ;;  %v478_v29 = vmul.f32 %v1665_v1, %v221_v21  ;;  %v732_v31 = vadd.f32 %v1670_v5, %v475_v20  ;;  %v479_v32 = vmul.f32 %v1665_v1, %v222_v24  ;;  %v733_v34 = vadd.f32 %v1670_v5, %v476_v23 }
  0x51   : > { %983 = vst [vmem:[%s1693_s24 + $0x8] sm:$0xff] %v727_v18  ;;  %v480_v35 = vmul.f32 %v1665_v1, %v223_v27  ;;  %v734_v37 = vadd.f32 %v1670_v5, %v477_v26  ;;  %v481_v38 = vmul.f32 %v1665_v1, %v224_v30  ;;  %v482_v41 = vmul.f32 %v1665_v1, %v225_v33 }
  0x52   : > { %984 = vst [vmem:[%s1693_s24 + $0x10] sm:$0xff] %v728_v19  ;;  %v735_v40 = vadd.f32 %v1670_v5, %v478_v29  ;;  %v736_v43 = vadd.f32 %v1670_v5, %v479_v32  ;;  %v483_v44 = vmul.f32 %v1665_v1, %v226_v36  ;;  %v484_v47 = vmul.f32 %v1665_v1, %v227_v39  ;;  %v241_v19 = vld [vmem:[%s1658_s30 + $0xe8] sm:$0xff] }
  0x53   : > { %985 = vst [vmem:[%s1693_s24 + $0x18] sm:$0xff] %v729_v22  ;;  %v737_v46 = vadd.f32 %v1670_v5, %v480_v35  ;;  %v738_v49 = vadd.f32 %v1670_v5, %v481_v38  ;;  %v485_v50 = vmul.f32 %v1665_v1, %v228_v42  ;;  %v739_v52 = vadd.f32 %v1670_v5, %v482_v41  ;;  %v242_v22 = vld [vmem:[%s1658_s30 + $0xf0] sm:$0xff] }
  0x54   : > { %986 = vst [vmem:[%s1693_s24 + $0x20] sm:$0xff] %v730_v25  ;;  %v486_v53 = vmul.f32 %v1665_v1, %v229_v45  ;;  %v740_v55 = vadd.f32 %v1670_v5, %v483_v44  ;;  %v487_v56 = vmul.f32 %v1665_v1, %v230_v48  ;;  %v741_v58 = vadd.f32 %v1670_v5, %v484_v47  ;;  %v243_v25 = vld [vmem:[%s1658_s30 + $0xf8] sm:$0xff] }
  0x55   : > { %987 = vst [vmem:[%s1693_s24 + $0x28] sm:$0xff] %v731_v28  ;;  %v488_v59 = vmul.f32 %v1665_v1, %v231_v51  ;;  %v742_v61 = vadd.f32 %v1670_v5, %v485_v50  ;;  %v489_v62 = vmul.f32 %v1665_v1, %v232_v54  ;;  %v490_v2 = vmul.f32 %v1665_v1, %v233_v57  ;;  %v244_v28 = vld [vmem:[%s1658_s30 + $0x100] sm:$0xff] }
  0x56   : > { %988 = vst [vmem:[%s1693_s24 + $0x30] sm:$0xff] %v732_v31  ;;  %v743_v0 = vadd.f32 %v1670_v5, %v486_v53  ;;  %v744_v4 = vadd.f32 %v1670_v5, %v487_v56  ;;  %v491_v6 = vmul.f32 %v1665_v1, %v234_v60  ;;  %v492_v9 = vmul.f32 %v1665_v1, %v235_v63  ;;  %v245_v31 = vld [vmem:[%s1658_s30 + $0x108] sm:$0xff] }
  0x57   : > { %989 = vst [vmem:[%s1693_s24 + $0x38] sm:$0xff] %v733_v34  ;;  %v745_v8 = vadd.f32 %v1670_v5, %v488_v59  ;;  %v746_v11 = vadd.f32 %v1670_v5, %v489_v62  ;;  %v493_v12 = vmul.f32 %v1665_v1, %v236_v3  ;;  %v747_v14 = vadd.f32 %v1670_v5, %v490_v2  ;;  %v246_v34 = vld [vmem:[%s1658_s30 + $0x110] sm:$0xff] }
  0x58   : > { %990 = vst [vmem:[%s1693_s24 + $0x40] sm:$0xff] %v734_v37  ;;  %v494_v15 = vmul.f32 %v1665_v1, %v237_v7  ;;  %v748_v17 = vadd.f32 %v1670_v5, %v491_v6  ;;  %v495_v18 = vmul.f32 %v1665_v1, %v238_v10  ;;  %v749_v20 = vadd.f32 %v1670_v5, %v492_v9  ;;  %v247_v37 = vld [vmem:[%s1658_s30 + $0x118] sm:$0xff] }
  0x59   : > { %991 = vst [vmem:[%s1693_s24 + $0x48] sm:$0xff] %v735_v40  ;;  %v496_v21 = vmul.f32 %v1665_v1, %v239_v13  ;;  %v750_v23 = vadd.f32 %v1670_v5, %v493_v12  ;;  %v497_v24 = vmul.f32 %v1665_v1, %v240_v16  ;;  %v498_v27 = vmul.f32 %v1665_v1, %v241_v19  ;;  %v248_v40 = vld [vmem:[%s1658_s30 + $0x120] sm:$0xff] }
  0x5a   : > { %992 = vst [vmem:[%s1693_s24 + $0x50] sm:$0xff] %v736_v43  ;;  %v751_v26 = vadd.f32 %v1670_v5, %v494_v15  ;;  %v752_v29 = vadd.f32 %v1670_v5, %v495_v18  ;;  %v499_v30 = vmul.f32 %v1665_v1, %v242_v22  ;;  %v500_v33 = vmul.f32 %v1665_v1, %v243_v25  ;;  %v249_v43 = vld [vmem:[%s1658_s30 + $0x128] sm:$0xff] }
  0x5b   : > { %993 = vst [vmem:[%s1693_s24 + $0x58] sm:$0xff] %v737_v46  ;;  %v753_v32 = vadd.f32 %v1670_v5, %v496_v21  ;;  %v754_v35 = vadd.f32 %v1670_v5, %v497_v24  ;;  %v501_v36 = vmul.f32 %v1665_v1, %v244_v28  ;;  %v755_v38 = vadd.f32 %v1670_v5, %v498_v27  ;;  %v250_v46 = vld [vmem:[%s1658_s30 + $0x130] sm:$0xff] }
  0x5c   : > { %994 = vst [vmem:[%s1693_s24 + $0x60] sm:$0xff] %v738_v49  ;;  %v502_v39 = vmul.f32 %v1665_v1, %v245_v31  ;;  %v756_v41 = vadd.f32 %v1670_v5, %v499_v30  ;;  %v503_v42 = vmul.f32 %v1665_v1, %v246_v34  ;;  %v757_v44 = vadd.f32 %v1670_v5, %v500_v33  ;;  %v251_v49 = vld [vmem:[%s1658_s30 + $0x138] sm:$0xff] }
  0x5d   : > { %995 = vst [vmem:[%s1693_s24 + $0x68] sm:$0xff] %v739_v52  ;;  %v504_v45 = vmul.f32 %v1665_v1, %v247_v37  ;;  %v758_v47 = vadd.f32 %v1670_v5, %v501_v36  ;;  %v505_v48 = vmul.f32 %v1665_v1, %v248_v40  ;;  %v506_v51 = vmul.f32 %v1665_v1, %v249_v43  ;;  %v252_v52 = vld [vmem:[%s1658_s30 + $0x140] sm:$0xff] }
  0x5e   : > { %996 = vst [vmem:[%s1693_s24 + $0x70] sm:$0xff] %v740_v55  ;;  %v759_v50 = vadd.f32 %v1670_v5, %v502_v39  ;;  %v760_v53 = vadd.f32 %v1670_v5, %v503_v42  ;;  %v507_v54 = vmul.f32 %v1665_v1, %v250_v46  ;;  %v253_v55 = vld [vmem:[%s1658_s30 + $0x148] sm:$0xff]  ;;  %v508_v57 = vmul.f32 %v1665_v1, %v251_v49 }
  0x5f   : > { %997 = vst [vmem:[%s1693_s24 + $0x78] sm:$0xff] %v741_v58  ;;  %v761_v56 = vadd.f32 %v1670_v5, %v504_v45  ;;  %v254_v58 = vld [vmem:[%s1658_s30 + $0x150] sm:$0xff]  ;;  %v762_v59 = vadd.f32 %v1670_v5, %v505_v48  ;;  %v509_v60 = vmul.f32 %v1665_v1, %v252_v52  ;;  %v763_v62 = vadd.f32 %v1670_v5, %v506_v51 }
  0x60   : > { %998 = vst [vmem:[%s1693_s24 + $0x80] sm:$0xff] %v742_v61  ;;  %v255_v61 = vld [vmem:[%s1658_s30 + $0x158] sm:$0xff]  ;;  %v510_v63 = vmul.f32 %v1665_v1, %v253_v55  ;;  %v764_v2 = vadd.f32 %v1670_v5, %v507_v54  ;;  %v511_v3 = vmul.f32 %v1665_v1, %v254_v58  ;;  %v765_v6 = vadd.f32 %v1670_v5, %v508_v57 }
  0x61   : > { %999 = vst [vmem:[%s1693_s24 + $0x88] sm:$0xff] %v743_v0  ;;  %v256_v0 = vld [vmem:[%s1658_s30 + $0x160] sm:$0xff]  ;;  %v512_v7 = vmul.f32 %v1665_v1, %v255_v61  ;;  %v766_v9 = vadd.f32 %v1670_v5, %v509_v60 }
  0x62   : > { %1000 = vst [vmem:[%s1693_s24 + $0x90] sm:$0xff] %v744_v4  ;;  %v257_v4 = vld [vmem:[%s1658_s30 + $0x168] sm:$0xff]  ;;  %v513_v10 = vmul.f32 %v1665_v1, %v256_v0  ;;  %v767_v12 = vadd.f32 %v1670_v5, %v510_v63  ;;  %v768_v15 = vadd.f32 %v1670_v5, %v511_v3 }
  0x63   : > { %1001 = vst [vmem:[%s1693_s24 + $0x98] sm:$0xff] %v745_v8  ;;  %v258_v8 = vld [vmem:[%s1658_s30 + $0x170] sm:$0xff]  ;;  %v514_v13 = vmul.f32 %v1665_v1, %v257_v4  ;;  %v769_v18 = vadd.f32 %v1670_v5, %v512_v7 }
  0x64   : > { %1002 = vst [vmem:[%s1693_s24 + $0xa0] sm:$0xff] %v746_v11  ;;  %v259_v11 = vld [vmem:[%s1658_s30 + $0x178] sm:$0xff]  ;;  %v515_v16 = vmul.f32 %v1665_v1, %v258_v8  ;;  %v770_v21 = vadd.f32 %v1670_v5, %v513_v10 }
  0x65   : > { %1003 = vst [vmem:[%s1693_s24 + $0xa8] sm:$0xff] %v747_v14  ;;  %v260_v14 = vld [vmem:[%s1658_s30 + $0x180] sm:$0xff]  ;;  %v516_v19 = vmul.f32 %v1665_v1, %v259_v11  ;;  %v771_v24 = vadd.f32 %v1670_v5, %v514_v13 }
  0x66   : > { %1004 = vst [vmem:[%s1693_s24 + $0xb0] sm:$0xff] %v748_v17  ;;  %v261_v17 = vld [vmem:[%s1658_s30 + $0x188] sm:$0xff]  ;;  %v517_v22 = vmul.f32 %v1665_v1, %v260_v14  ;;  %v772_v27 = vadd.f32 %v1670_v5, %v515_v16 }
  0x67   : > { %1005 = vst [vmem:[%s1693_s24 + $0xb8] sm:$0xff] %v749_v20  ;;  %v262_v20 = vld [vmem:[%s1658_s30 + $0x190] sm:$0xff]  ;;  %v518_v25 = vmul.f32 %v1665_v1, %v261_v17  ;;  %v773_v30 = vadd.f32 %v1670_v5, %v516_v19 }
  0x68   : > { %1006 = vst [vmem:[%s1693_s24 + $0xc0] sm:$0xff] %v750_v23  ;;  %v263_v23 = vld [vmem:[%s1658_s30 + $0x198] sm:$0xff]  ;;  %v519_v28 = vmul.f32 %v1665_v1, %v262_v20  ;;  %v774_v33 = vadd.f32 %v1670_v5, %v517_v22 }
  0x69   : > { %1007 = vst [vmem:[%s1693_s24 + $0xc8] sm:$0xff] %v751_v26  ;;  %v264_v26 = vld [vmem:[%s1658_s30 + $0x1a0] sm:$0xff]  ;;  %v520_v31 = vmul.f32 %v1665_v1, %v263_v23  ;;  %v775_v36 = vadd.f32 %v1670_v5, %v518_v25 }
  0x6a   : > { %1008 = vst [vmem:[%s1693_s24 + $0xd0] sm:$0xff] %v752_v29  ;;  %v265_v29 = vld [vmem:[%s1658_s30 + $0x1a8] sm:$0xff]  ;;  %v521_v34 = vmul.f32 %v1665_v1, %v264_v26  ;;  %v776_v39 = vadd.f32 %v1670_v5, %v519_v28 }
  0x6b   : > { %1009 = vst [vmem:[%s1693_s24 + $0xd8] sm:$0xff] %v753_v32  ;;  %v266_v32 = vld [vmem:[%s1658_s30 + $0x1b0] sm:$0xff]  ;;  %v522_v37 = vmul.f32 %v1665_v1, %v265_v29  ;;  %v777_v42 = vadd.f32 %v1670_v5, %v520_v31 }
  0x6c   : > { %1010 = vst [vmem:[%s1693_s24 + $0xe0] sm:$0xff] %v754_v35  ;;  %v267_v35 = vld [vmem:[%s1658_s30 + $0x1b8] sm:$0xff]  ;;  %v523_v40 = vmul.f32 %v1665_v1, %v266_v32  ;;  %v778_v45 = vadd.f32 %v1670_v5, %v521_v34 }
  0x6d   : > { %1011 = vst [vmem:[%s1693_s24 + $0xe8] sm:$0xff] %v755_v38  ;;  %v268_v38 = vld [vmem:[%s1658_s30 + $0x1c0] sm:$0xff]  ;;  %v524_v43 = vmul.f32 %v1665_v1, %v267_v35  ;;  %v779_v48 = vadd.f32 %v1670_v5, %v522_v37 }
  0x6e   : > { %1012 = vst [vmem:[%s1693_s24 + $0xf0] sm:$0xff] %v756_v41  ;;  %v269_v41 = vld [vmem:[%s1658_s30 + $0x1c8] sm:$0xff]  ;;  %v525_v46 = vmul.f32 %v1665_v1, %v268_v38  ;;  %v780_v51 = vadd.f32 %v1670_v5, %v523_v40 }
  0x6f   : > { %1013 = vst [vmem:[%s1693_s24 + $0xf8] sm:$0xff] %v757_v44  ;;  %v270_v44 = vld [vmem:[%s1658_s30 + $0x1d0] sm:$0xff]  ;;  %v526_v49 = vmul.f32 %v1665_v1, %v269_v41  ;;  %v781_v54 = vadd.f32 %v1670_v5, %v524_v43 }
  0x70   : > { %1014 = vst [vmem:[%s1693_s24 + $0x100] sm:$0xff] %v758_v47  ;;  %v271_v47 = vld [vmem:[%s1658_s30 + $0x1d8] sm:$0xff]  ;;  %v527_v52 = vmul.f32 %v1665_v1, %v270_v44  ;;  %v782_v57 = vadd.f32 %v1670_v5, %v525_v46 }
  0x71   : > { %1015 = vst [vmem:[%s1693_s24 + $0x108] sm:$0xff] %v759_v50  ;;  %v272_v50 = vld [vmem:[%s1658_s30 + $0x1e0] sm:$0xff]  ;;  %v528_v55 = vmul.f32 %v1665_v1, %v271_v47  ;;  %v783_v60 = vadd.f32 %v1670_v5, %v526_v49 }
  0x72   : > { %1016 = vst [vmem:[%s1693_s24 + $0x110] sm:$0xff] %v760_v53  ;;  %v273_v53 = vld [vmem:[%s1658_s30 + $0x1e8] sm:$0xff]  ;;  %v529_v58 = vmul.f32 %v1665_v1, %v272_v50  ;;  %v784_v63 = vadd.f32 %v1670_v5, %v527_v52 }
  0x73   : > { %1017 = vst [vmem:[%s1693_s24 + $0x118] sm:$0xff] %v761_v56  ;;  %v274_v56 = vld [vmem:[%s1658_s30 + $0x1f0] sm:$0xff]  ;;  %v530_v61 = vmul.f32 %v1665_v1, %v273_v53  ;;  %v785_v3 = vadd.f32 %v1670_v5, %v528_v55 }
  0x74   : > { %1018 = vst [vmem:[%s1693_s24 + $0x120] sm:$0xff] %v762_v59  ;;  %v275_v59 = vld [vmem:[%s1658_s30 + $0x1f8] sm:$0xff]  ;;  %v531_v0 = vmul.f32 %v1665_v1, %v274_v56  ;;  %v786_v7 = vadd.f32 %v1670_v5, %v529_v58 }
  0x75   : > { %1019 = vst [vmem:[%s1693_s24 + $0x128] sm:$0xff] %v763_v62  ;;  %v276_v62 = vld [vmem:[%s1658_s30 + $0x200] sm:$0xff]  ;;  %v532_v4 = vmul.f32 %v1665_v1, %v275_v59  ;;  %v787_v10 = vadd.f32 %v1670_v5, %v530_v61 }
  0x76   : > { %1020 = vst [vmem:[%s1693_s24 + $0x130] sm:$0xff] %v764_v2  ;;  %v277_v2 = vld [vmem:[%s1658_s30 + $0x208] sm:$0xff]  ;;  %v533_v8 = vmul.f32 %v1665_v1, %v276_v62  ;;  %v788_v13 = vadd.f32 %v1670_v5, %v531_v0 }
  0x77   : > { %1021 = vst [vmem:[%s1693_s24 + $0x138] sm:$0xff] %v765_v6  ;;  %v278_v6 = vld [vmem:[%s1658_s30 + $0x210] sm:$0xff]  ;;  %v534_v11 = vmul.f32 %v1665_v1, %v277_v2  ;;  %v789_v16 = vadd.f32 %v1670_v5, %v532_v4 }
  0x78   : > { %1022 = vst [vmem:[%s1693_s24 + $0x140] sm:$0xff] %v766_v9  ;;  %v279_v9 = vld [vmem:[%s1658_s30 + $0x218] sm:$0xff]  ;;  %v535_v14 = vmul.f32 %v1665_v1, %v278_v6  ;;  %v790_v19 = vadd.f32 %v1670_v5, %v533_v8 }
  0x79   : > { %1023 = vst [vmem:[%s1693_s24 + $0x148] sm:$0xff] %v767_v12  ;;  %v280_v12 = vld [vmem:[%s1658_s30 + $0x220] sm:$0xff]  ;;  %v536_v17 = vmul.f32 %v1665_v1, %v279_v9  ;;  %v791_v22 = vadd.f32 %v1670_v5, %v534_v11 }
  0x7a   : > { %1024 = vst [vmem:[%s1693_s24 + $0x150] sm:$0xff] %v768_v15  ;;  %v281_v15 = vld [vmem:[%s1658_s30 + $0x228] sm:$0xff]  ;;  %v537_v20 = vmul.f32 %v1665_v1, %v280_v12  ;;  %v792_v25 = vadd.f32 %v1670_v5, %v535_v14 }
  0x7b   : > { %1025 = vst [vmem:[%s1693_s24 + $0x158] sm:$0xff] %v769_v18  ;;  %v282_v18 = vld [vmem:[%s1658_s30 + $0x230] sm:$0xff]  ;;  %v538_v23 = vmul.f32 %v1665_v1, %v281_v15  ;;  %v793_v28 = vadd.f32 %v1670_v5, %v536_v17 }
  0x7c   : > { %1026 = vst [vmem:[%s1693_s24 + $0x160] sm:$0xff] %v770_v21  ;;  %v283_v21 = vld [vmem:[%s1658_s30 + $0x238] sm:$0xff]  ;;  %v539_v26 = vmul.f32 %v1665_v1, %v282_v18  ;;  %v794_v31 = vadd.f32 %v1670_v5, %v537_v20 }
  0x7d   : > { %1027 = vst [vmem:[%s1693_s24 + $0x168] sm:$0xff] %v771_v24  ;;  %v284_v24 = vld [vmem:[%s1658_s30 + $0x240] sm:$0xff]  ;;  %v540_v29 = vmul.f32 %v1665_v1, %v283_v21  ;;  %v795_v34 = vadd.f32 %v1670_v5, %v538_v23 }
  0x7e   : > { %1028 = vst [vmem:[%s1693_s24 + $0x170] sm:$0xff] %v772_v27  ;;  %v285_v27 = vld [vmem:[%s1658_s30 + $0x248] sm:$0xff]  ;;  %v541_v32 = vmul.f32 %v1665_v1, %v284_v24  ;;  %v796_v37 = vadd.f32 %v1670_v5, %v539_v26 }
  0x7f   : > { %1029 = vst [vmem:[%s1693_s24 + $0x178] sm:$0xff] %v773_v30  ;;  %v286_v30 = vld [vmem:[%s1658_s30 + $0x250] sm:$0xff]  ;;  %v542_v35 = vmul.f32 %v1665_v1, %v285_v27  ;;  %v797_v40 = vadd.f32 %v1670_v5, %v540_v29 }
  0x80   : > { %1030 = vst [vmem:[%s1693_s24 + $0x180] sm:$0xff] %v774_v33  ;;  %v287_v33 = vld [vmem:[%s1658_s30 + $0x258] sm:$0xff]  ;;  %v543_v38 = vmul.f32 %v1665_v1, %v286_v30  ;;  %v798_v43 = vadd.f32 %v1670_v5, %v541_v32 }
  0x81   : > { %1031 = vst [vmem:[%s1693_s24 + $0x188] sm:$0xff] %v775_v36  ;;  %v288_v36 = vld [vmem:[%s1658_s30 + $0x260] sm:$0xff]  ;;  %v544_v41 = vmul.f32 %v1665_v1, %v287_v33  ;;  %v799_v46 = vadd.f32 %v1670_v5, %v542_v35 }
  0x82   : > { %1032 = vst [vmem:[%s1693_s24 + $0x190] sm:$0xff] %v776_v39  ;;  %v289_v39 = vld [vmem:[%s1658_s30 + $0x268] sm:$0xff]  ;;  %v545_v44 = vmul.f32 %v1665_v1, %v288_v36  ;;  %v800_v49 = vadd.f32 %v1670_v5, %v543_v38 }
  0x83   : > { %1033 = vst [vmem:[%s1693_s24 + $0x198] sm:$0xff] %v777_v42  ;;  %v290_v42 = vld [vmem:[%s1658_s30 + $0x270] sm:$0xff]  ;;  %v546_v47 = vmul.f32 %v1665_v1, %v289_v39  ;;  %v801_v52 = vadd.f32 %v1670_v5, %v544_v41 }
  0x84   : > { %1034 = vst [vmem:[%s1693_s24 + $0x1a0] sm:$0xff] %v778_v45  ;;  %v291_v45 = vld [vmem:[%s1658_s30 + $0x278] sm:$0xff]  ;;  %v547_v50 = vmul.f32 %v1665_v1, %v290_v42  ;;  %v802_v55 = vadd.f32 %v1670_v5, %v545_v44 }
  0x85   : > { %1035 = vst [vmem:[%s1693_s24 + $0x1a8] sm:$0xff] %v779_v48  ;;  %v292_v48 = vld [vmem:[%s1658_s30 + $0x280] sm:$0xff]  ;;  %v548_v53 = vmul.f32 %v1665_v1, %v291_v45  ;;  %v803_v58 = vadd.f32 %v1670_v5, %v546_v47 }
  0x86   : > { %1036 = vst [vmem:[%s1693_s24 + $0x1b0] sm:$0xff] %v780_v51  ;;  %v293_v51 = vld [vmem:[%s1658_s30 + $0x288] sm:$0xff]  ;;  %v549_v56 = vmul.f32 %v1665_v1, %v292_v48  ;;  %v804_v61 = vadd.f32 %v1670_v5, %v547_v50 }
  0x87   : > { %1037 = vst [vmem:[%s1693_s24 + $0x1b8] sm:$0xff] %v781_v54  ;;  %v294_v54 = vld [vmem:[%s1658_s30 + $0x290] sm:$0xff]  ;;  %v550_v59 = vmul.f32 %v1665_v1, %v293_v51  ;;  %v805_v0 = vadd.f32 %v1670_v5, %v548_v53 }
  0x88   : > { %1038 = vst [vmem:[%s1693_s24 + $0x1c0] sm:$0xff] %v782_v57  ;;  %v295_v57 = vld [vmem:[%s1658_s30 + $0x298] sm:$0xff]  ;;  %v551_v62 = vmul.f32 %v1665_v1, %v294_v54  ;;  %v806_v4 = vadd.f32 %v1670_v5, %v549_v56 }
  0x89   : > { %1039 = vst [vmem:[%s1693_s24 + $0x1c8] sm:$0xff] %v783_v60  ;;  %v296_v60 = vld [vmem:[%s1658_s30 + $0x2a0] sm:$0xff]  ;;  %v552_v2 = vmul.f32 %v1665_v1, %v295_v57  ;;  %v807_v8 = vadd.f32 %v1670_v5, %v550_v59 }
  0x8a   : > { %1040 = vst [vmem:[%s1693_s24 + $0x1d0] sm:$0xff] %v784_v63  ;;  %v297_v63 = vld [vmem:[%s1658_s30 + $0x2a8] sm:$0xff]  ;;  %v553_v6 = vmul.f32 %v1665_v1, %v296_v60  ;;  %v808_v11 = vadd.f32 %v1670_v5, %v551_v62 }
  0x8b   : > { %1041 = vst [vmem:[%s1693_s24 + $0x1d8] sm:$0xff] %v785_v3  ;;  %v298_v3 = vld [vmem:[%s1658_s30 + $0x2b0] sm:$0xff]  ;;  %v554_v9 = vmul.f32 %v1665_v1, %v297_v63  ;;  %v809_v14 = vadd.f32 %v1670_v5, %v552_v2 }
  0x8c   : > { %1042 = vst [vmem:[%s1693_s24 + $0x1e0] sm:$0xff] %v786_v7  ;;  %v299_v7 = vld [vmem:[%s1658_s30 + $0x2b8] sm:$0xff]  ;;  %v555_v12 = vmul.f32 %v1665_v1, %v298_v3  ;;  %v810_v17 = vadd.f32 %v1670_v5, %v553_v6 }
  0x8d   : > { %1043 = vst [vmem:[%s1693_s24 + $0x1e8] sm:$0xff] %v787_v10  ;;  %v300_v10 = vld [vmem:[%s1658_s30 + $0x2c0] sm:$0xff]  ;;  %v556_v15 = vmul.f32 %v1665_v1, %v299_v7  ;;  %v811_v20 = vadd.f32 %v1670_v5, %v554_v9 }
  0x8e   : > { %1044 = vst [vmem:[%s1693_s24 + $0x1f0] sm:$0xff] %v788_v13  ;;  %v301_v13 = vld [vmem:[%s1658_s30 + $0x2c8] sm:$0xff]  ;;  %v557_v18 = vmul.f32 %v1665_v1, %v300_v10  ;;  %v812_v23 = vadd.f32 %v1670_v5, %v555_v12 }
  0x8f   : > { %1045 = vst [vmem:[%s1693_s24 + $0x1f8] sm:$0xff] %v789_v16  ;;  %v302_v16 = vld [vmem:[%s1658_s30 + $0x2d0] sm:$0xff]  ;;  %v558_v21 = vmul.f32 %v1665_v1, %v301_v13  ;;  %v813_v26 = vadd.f32 %v1670_v5, %v556_v15 }
  0x90   : > { %1046 = vst [vmem:[%s1693_s24 + $0x200] sm:$0xff] %v790_v19  ;;  %v303_v19 = vld [vmem:[%s1658_s30 + $0x2d8] sm:$0xff]  ;;  %v559_v24 = vmul.f32 %v1665_v1, %v302_v16  ;;  %v814_v29 = vadd.f32 %v1670_v5, %v557_v18 }
  0x91   : > { %1047 = vst [vmem:[%s1693_s24 + $0x208] sm:$0xff] %v791_v22  ;;  %v304_v22 = vld [vmem:[%s1658_s30 + $0x2e0] sm:$0xff]  ;;  %v560_v27 = vmul.f32 %v1665_v1, %v303_v19  ;;  %v815_v32 = vadd.f32 %v1670_v5, %v558_v21 }
  0x92   : > { %1048 = vst [vmem:[%s1693_s24 + $0x210] sm:$0xff] %v792_v25  ;;  %v305_v25 = vld [vmem:[%s1658_s30 + $0x2e8] sm:$0xff]  ;;  %v561_v30 = vmul.f32 %v1665_v1, %v304_v22  ;;  %v816_v35 = vadd.f32 %v1670_v5, %v559_v24 }
  0x93   : > { %1049 = vst [vmem:[%s1693_s24 + $0x218] sm:$0xff] %v793_v28  ;;  %v306_v28 = vld [vmem:[%s1658_s30 + $0x2f0] sm:$0xff]  ;;  %v562_v33 = vmul.f32 %v1665_v1, %v305_v25  ;;  %v817_v38 = vadd.f32 %v1670_v5, %v560_v27 }
  0x94   : > { %1050 = vst [vmem:[%s1693_s24 + $0x220] sm:$0xff] %v794_v31  ;;  %v307_v31 = vld [vmem:[%s1658_s30 + $0x2f8] sm:$0xff]  ;;  %v563_v36 = vmul.f32 %v1665_v1, %v306_v28  ;;  %v818_v41 = vadd.f32 %v1670_v5, %v561_v30 }
  0x95   : > { %1051 = vst [vmem:[%s1693_s24 + $0x228] sm:$0xff] %v795_v34  ;;  %v308_v34 = vld [vmem:[%s1658_s30 + $0x300] sm:$0xff]  ;;  %v564_v39 = vmul.f32 %v1665_v1, %v307_v31  ;;  %v819_v44 = vadd.f32 %v1670_v5, %v562_v33 }
  0x96   : > { %1052 = vst [vmem:[%s1693_s24 + $0x230] sm:$0xff] %v796_v37  ;;  %v309_v37 = vld [vmem:[%s1658_s30 + $0x308] sm:$0xff]  ;;  %v565_v42 = vmul.f32 %v1665_v1, %v308_v34  ;;  %v820_v47 = vadd.f32 %v1670_v5, %v563_v36 }
  0x97   : > { %1053 = vst [vmem:[%s1693_s24 + $0x238] sm:$0xff] %v797_v40  ;;  %v310_v40 = vld [vmem:[%s1658_s30 + $0x310] sm:$0xff]  ;;  %v566_v45 = vmul.f32 %v1665_v1, %v309_v37  ;;  %v821_v50 = vadd.f32 %v1670_v5, %v564_v39 }
  0x98   : > { %1054 = vst [vmem:[%s1693_s24 + $0x240] sm:$0xff] %v798_v43  ;;  %v311_v43 = vld [vmem:[%s1658_s30 + $0x318] sm:$0xff]  ;;  %v567_v48 = vmul.f32 %v1665_v1, %v310_v40  ;;  %v822_v53 = vadd.f32 %v1670_v5, %v565_v42 }
  0x99   : > { %1055 = vst [vmem:[%s1693_s24 + $0x248] sm:$0xff] %v799_v46  ;;  %v312_v46 = vld [vmem:[%s1658_s30 + $0x320] sm:$0xff]  ;;  %v568_v51 = vmul.f32 %v1665_v1, %v311_v43  ;;  %v823_v56 = vadd.f32 %v1670_v5, %v566_v45 }
  0x9a   : > { %1056 = vst [vmem:[%s1693_s24 + $0x250] sm:$0xff] %v800_v49  ;;  %v313_v49 = vld [vmem:[%s1658_s30 + $0x328] sm:$0xff]  ;;  %v569_v54 = vmul.f32 %v1665_v1, %v312_v46  ;;  %v824_v59 = vadd.f32 %v1670_v5, %v567_v48 }
  0x9b   : > { %1057 = vst [vmem:[%s1693_s24 + $0x258] sm:$0xff] %v801_v52  ;;  %v314_v52 = vld [vmem:[%s1658_s30 + $0x330] sm:$0xff]  ;;  %v570_v57 = vmul.f32 %v1665_v1, %v313_v49  ;;  %v825_v62 = vadd.f32 %v1670_v5, %v568_v51 }
  0x9c   : > { %1058 = vst [vmem:[%s1693_s24 + $0x260] sm:$0xff] %v802_v55  ;;  %v315_v55 = vld [vmem:[%s1658_s30 + $0x338] sm:$0xff]  ;;  %v571_v60 = vmul.f32 %v1665_v1, %v314_v52  ;;  %v826_v2 = vadd.f32 %v1670_v5, %v569_v54 }
  0x9d   : > { %1059 = vst [vmem:[%s1693_s24 + $0x268] sm:$0xff] %v803_v58  ;;  %v316_v58 = vld [vmem:[%s1658_s30 + $0x340] sm:$0xff]  ;;  %v572_v63 = vmul.f32 %v1665_v1, %v315_v55  ;;  %v827_v6 = vadd.f32 %v1670_v5, %v570_v57 }
  0x9e   : > { %1060 = vst [vmem:[%s1693_s24 + $0x270] sm:$0xff] %v804_v61  ;;  %v317_v61 = vld [vmem:[%s1658_s30 + $0x348] sm:$0xff]  ;;  %v573_v3 = vmul.f32 %v1665_v1, %v316_v58  ;;  %v828_v9 = vadd.f32 %v1670_v5, %v571_v60 }
  0x9f   : > { %1061 = vst [vmem:[%s1693_s24 + $0x278] sm:$0xff] %v805_v0  ;;  %v318_v0 = vld [vmem:[%s1658_s30 + $0x350] sm:$0xff]  ;;  %v574_v7 = vmul.f32 %v1665_v1, %v317_v61  ;;  %v829_v12 = vadd.f32 %v1670_v5, %v572_v63 }
  0xa0   : > { %1062 = vst [vmem:[%s1693_s24 + $0x280] sm:$0xff] %v806_v4  ;;  %v319_v4 = vld [vmem:[%s1658_s30 + $0x358] sm:$0xff]  ;;  %v575_v10 = vmul.f32 %v1665_v1, %v318_v0  ;;  %v830_v15 = vadd.f32 %v1670_v5, %v573_v3 }
  0xa1   : > { %1063 = vst [vmem:[%s1693_s24 + $0x288] sm:$0xff] %v807_v8  ;;  %v320_v8 = vld [vmem:[%s1658_s30 + $0x360] sm:$0xff]  ;;  %v576_v13 = vmul.f32 %v1665_v1, %v319_v4  ;;  %v831_v18 = vadd.f32 %v1670_v5, %v574_v7 }
  0xa2   : > { %1064 = vst [vmem:[%s1693_s24 + $0x290] sm:$0xff] %v808_v11  ;;  %v321_v11 = vld [vmem:[%s1658_s30 + $0x368] sm:$0xff]  ;;  %v577_v16 = vmul.f32 %v1665_v1, %v320_v8  ;;  %v832_v21 = vadd.f32 %v1670_v5, %v575_v10 }
  0xa3   : > { %1065 = vst [vmem:[%s1693_s24 + $0x298] sm:$0xff] %v809_v14  ;;  %v322_v14 = vld [vmem:[%s1658_s30 + $0x370] sm:$0xff]  ;;  %v578_v19 = vmul.f32 %v1665_v1, %v321_v11  ;;  %v833_v24 = vadd.f32 %v1670_v5, %v576_v13 }
  0xa4   : > { %1066 = vst [vmem:[%s1693_s24 + $0x2a0] sm:$0xff] %v810_v17  ;;  %v323_v17 = vld [vmem:[%s1658_s30 + $0x378] sm:$0xff]  ;;  %v579_v22 = vmul.f32 %v1665_v1, %v322_v14  ;;  %v834_v27 = vadd.f32 %v1670_v5, %v577_v16 }
  0xa5   : > { %1067 = vst [vmem:[%s1693_s24 + $0x2a8] sm:$0xff] %v811_v20  ;;  %v324_v20 = vld [vmem:[%s1658_s30 + $0x380] sm:$0xff]  ;;  %v580_v25 = vmul.f32 %v1665_v1, %v323_v17  ;;  %v835_v30 = vadd.f32 %v1670_v5, %v578_v19 }
  0xa6   : > { %1068 = vst [vmem:[%s1693_s24 + $0x2b0] sm:$0xff] %v812_v23  ;;  %v325_v23 = vld [vmem:[%s1658_s30 + $0x388] sm:$0xff]  ;;  %v581_v28 = vmul.f32 %v1665_v1, %v324_v20  ;;  %v836_v33 = vadd.f32 %v1670_v5, %v579_v22 }
  0xa7   : > { %1069 = vst [vmem:[%s1693_s24 + $0x2b8] sm:$0xff] %v813_v26  ;;  %v326_v26 = vld [vmem:[%s1658_s30 + $0x390] sm:$0xff]  ;;  %v582_v31 = vmul.f32 %v1665_v1, %v325_v23  ;;  %v837_v36 = vadd.f32 %v1670_v5, %v580_v25 }
  0xa8   : > { %1070 = vst [vmem:[%s1693_s24 + $0x2c0] sm:$0xff] %v814_v29  ;;  %v327_v29 = vld [vmem:[%s1658_s30 + $0x398] sm:$0xff]  ;;  %v583_v34 = vmul.f32 %v1665_v1, %v326_v26  ;;  %v838_v39 = vadd.f32 %v1670_v5, %v581_v28 }
  0xa9   : > { %1071 = vst [vmem:[%s1693_s24 + $0x2c8] sm:$0xff] %v815_v32  ;;  %v328_v32 = vld [vmem:[%s1658_s30 + $0x3a0] sm:$0xff]  ;;  %v584_v37 = vmul.f32 %v1665_v1, %v327_v29  ;;  %v839_v42 = vadd.f32 %v1670_v5, %v582_v31 }
  0xaa   : > { %1072 = vst [vmem:[%s1693_s24 + $0x2d0] sm:$0xff] %v816_v35  ;;  %v329_v35 = vld [vmem:[%s1658_s30 + $0x3a8] sm:$0xff]  ;;  %v585_v40 = vmul.f32 %v1665_v1, %v328_v32  ;;  %v840_v45 = vadd.f32 %v1670_v5, %v583_v34 }
  0xab   : > { %1073 = vst [vmem:[%s1693_s24 + $0x2d8] sm:$0xff] %v817_v38  ;;  %v330_v38 = vld [vmem:[%s1658_s30 + $0x3b0] sm:$0xff]  ;;  %v586_v43 = vmul.f32 %v1665_v1, %v329_v35  ;;  %v841_v48 = vadd.f32 %v1670_v5, %v584_v37 }
  0xac   : > { %1074 = vst [vmem:[%s1693_s24 + $0x2e0] sm:$0xff] %v818_v41  ;;  %v331_v41 = vld [vmem:[%s1658_s30 + $0x3b8] sm:$0xff]  ;;  %v587_v46 = vmul.f32 %v1665_v1, %v330_v38  ;;  %v842_v51 = vadd.f32 %v1670_v5, %v585_v40 }
  0xad   : > { %1075 = vst [vmem:[%s1693_s24 + $0x2e8] sm:$0xff] %v819_v44  ;;  %v332_v44 = vld [vmem:[%s1658_s30 + $0x3c0] sm:$0xff]  ;;  %v588_v49 = vmul.f32 %v1665_v1, %v331_v41  ;;  %v843_v54 = vadd.f32 %v1670_v5, %v586_v43 }
  0xae   : > { %1076 = vst [vmem:[%s1693_s24 + $0x2f0] sm:$0xff] %v820_v47  ;;  %v333_v47 = vld [vmem:[%s1658_s30 + $0x3c8] sm:$0xff]  ;;  %v589_v52 = vmul.f32 %v1665_v1, %v332_v44  ;;  %v844_v57 = vadd.f32 %v1670_v5, %v587_v46 }
  0xaf   : > { %1077 = vst [vmem:[%s1693_s24 + $0x2f8] sm:$0xff] %v821_v50  ;;  %v334_v50 = vld [vmem:[%s1658_s30 + $0x3d0] sm:$0xff]  ;;  %v590_v55 = vmul.f32 %v1665_v1, %v333_v47  ;;  %v845_v60 = vadd.f32 %v1670_v5, %v588_v49 }
  0xb0   : > { %1078 = vst [vmem:[%s1693_s24 + $0x300] sm:$0xff] %v822_v53  ;;  %v335_v53 = vld [vmem:[%s1658_s30 + $0x3d8] sm:$0xff]  ;;  %v591_v58 = vmul.f32 %v1665_v1, %v334_v50  ;;  %v846_v63 = vadd.f32 %v1670_v5, %v589_v52 }
  0xb1   : > { %1079 = vst [vmem:[%s1693_s24 + $0x308] sm:$0xff] %v823_v56  ;;  %v336_v56 = vld [vmem:[%s1658_s30 + $0x3e0] sm:$0xff]  ;;  %v592_v61 = vmul.f32 %v1665_v1, %v335_v53  ;;  %v847_v3 = vadd.f32 %v1670_v5, %v590_v55 }
  0xb2   : > { %1080 = vst [vmem:[%s1693_s24 + $0x310] sm:$0xff] %v824_v59  ;;  %v337_v59 = vld [vmem:[%s1658_s30 + $0x3e8] sm:$0xff]  ;;  %v593_v0 = vmul.f32 %v1665_v1, %v336_v56  ;;  %v848_v7 = vadd.f32 %v1670_v5, %v591_v58 }
  0xb3   : > { %1081 = vst [vmem:[%s1693_s24 + $0x318] sm:$0xff] %v825_v62  ;;  %v338_v62 = vld [vmem:[%s1658_s30 + $0x3f0] sm:$0xff]  ;;  %v594_v4 = vmul.f32 %v1665_v1, %v337_v59  ;;  %v849_v10 = vadd.f32 %v1670_v5, %v592_v61 }
  0xb4   : > { %1082 = vst [vmem:[%s1693_s24 + $0x320] sm:$0xff] %v826_v2  ;;  %v339_v2 = vld [vmem:[%s1658_s30 + $0x3f8] sm:$0xff]  ;;  %v595_v8 = vmul.f32 %v1665_v1, %v338_v62  ;;  %v850_v13 = vadd.f32 %v1670_v5, %v593_v0 }
  0xb5   : > { %1083 = vst [vmem:[%s1693_s24 + $0x328] sm:$0xff] %v827_v6  ;;  %v340_v6 = vld [vmem:[%s1658_s30 + $0x400] sm:$0xff]  ;;  %v596_v11 = vmul.f32 %v1665_v1, %v339_v2  ;;  %v851_v16 = vadd.f32 %v1670_v5, %v594_v4 }
  0xb6   : > { %1084 = vst [vmem:[%s1693_s24 + $0x330] sm:$0xff] %v828_v9  ;;  %v341_v9 = vld [vmem:[%s1658_s30 + $0x408] sm:$0xff]  ;;  %v597_v14 = vmul.f32 %v1665_v1, %v340_v6  ;;  %v852_v19 = vadd.f32 %v1670_v5, %v595_v8 }
  0xb7   : > { %1085 = vst [vmem:[%s1693_s24 + $0x338] sm:$0xff] %v829_v12  ;;  %v342_v12 = vld [vmem:[%s1658_s30 + $0x410] sm:$0xff]  ;;  %v598_v17 = vmul.f32 %v1665_v1, %v341_v9  ;;  %v853_v22 = vadd.f32 %v1670_v5, %v596_v11 }
  0xb8   : > { %1086 = vst [vmem:[%s1693_s24 + $0x340] sm:$0xff] %v830_v15  ;;  %v343_v15 = vld [vmem:[%s1658_s30 + $0x418] sm:$0xff]  ;;  %v599_v20 = vmul.f32 %v1665_v1, %v342_v12  ;;  %v854_v25 = vadd.f32 %v1670_v5, %v597_v14 }
  0xb9   : > { %1087 = vst [vmem:[%s1693_s24 + $0x348] sm:$0xff] %v831_v18  ;;  %v344_v18 = vld [vmem:[%s1658_s30 + $0x420] sm:$0xff]  ;;  %v600_v23 = vmul.f32 %v1665_v1, %v343_v15  ;;  %v855_v28 = vadd.f32 %v1670_v5, %v598_v17 }
  0xba   : > { %1088 = vst [vmem:[%s1693_s24 + $0x350] sm:$0xff] %v832_v21  ;;  %v345_v21 = vld [vmem:[%s1658_s30 + $0x428] sm:$0xff]  ;;  %v601_v26 = vmul.f32 %v1665_v1, %v344_v18  ;;  %v856_v31 = vadd.f32 %v1670_v5, %v599_v20 }
  0xbb   : > { %1089 = vst [vmem:[%s1693_s24 + $0x358] sm:$0xff] %v833_v24  ;;  %v346_v24 = vld [vmem:[%s1658_s30 + $0x430] sm:$0xff]  ;;  %v602_v29 = vmul.f32 %v1665_v1, %v345_v21  ;;  %v857_v34 = vadd.f32 %v1670_v5, %v600_v23 }
  0xbc   : > { %1090 = vst [vmem:[%s1693_s24 + $0x360] sm:$0xff] %v834_v27  ;;  %v347_v27 = vld [vmem:[%s1658_s30 + $0x438] sm:$0xff]  ;;  %v603_v32 = vmul.f32 %v1665_v1, %v346_v24  ;;  %v858_v37 = vadd.f32 %v1670_v5, %v601_v26 }
  0xbd   : > { %1091 = vst [vmem:[%s1693_s24 + $0x368] sm:$0xff] %v835_v30  ;;  %v348_v30 = vld [vmem:[%s1658_s30 + $0x440] sm:$0xff]  ;;  %v604_v35 = vmul.f32 %v1665_v1, %v347_v27  ;;  %v859_v40 = vadd.f32 %v1670_v5, %v602_v29 }
  0xbe   : > { %1092 = vst [vmem:[%s1693_s24 + $0x370] sm:$0xff] %v836_v33  ;;  %v349_v33 = vld [vmem:[%s1658_s30 + $0x448] sm:$0xff]  ;;  %v605_v38 = vmul.f32 %v1665_v1, %v348_v30  ;;  %v860_v43 = vadd.f32 %v1670_v5, %v603_v32 }
  0xbf   : > { %1093 = vst [vmem:[%s1693_s24 + $0x378] sm:$0xff] %v837_v36  ;;  %v350_v36 = vld [vmem:[%s1658_s30 + $0x450] sm:$0xff]  ;;  %v606_v41 = vmul.f32 %v1665_v1, %v349_v33  ;;  %v861_v46 = vadd.f32 %v1670_v5, %v604_v35 }
  0xc0   : > { %1094 = vst [vmem:[%s1693_s24 + $0x380] sm:$0xff] %v838_v39  ;;  %v351_v39 = vld [vmem:[%s1658_s30 + $0x458] sm:$0xff]  ;;  %v607_v44 = vmul.f32 %v1665_v1, %v350_v36  ;;  %v862_v49 = vadd.f32 %v1670_v5, %v605_v38 }
  0xc1   : > { %1095 = vst [vmem:[%s1693_s24 + $0x388] sm:$0xff] %v839_v42  ;;  %v352_v42 = vld [vmem:[%s1658_s30 + $0x460] sm:$0xff]  ;;  %v608_v47 = vmul.f32 %v1665_v1, %v351_v39  ;;  %v863_v52 = vadd.f32 %v1670_v5, %v606_v41 }
  0xc2   : > { %1096 = vst [vmem:[%s1693_s24 + $0x390] sm:$0xff] %v840_v45  ;;  %v353_v45 = vld [vmem:[%s1658_s30 + $0x468] sm:$0xff]  ;;  %v609_v50 = vmul.f32 %v1665_v1, %v352_v42  ;;  %v864_v55 = vadd.f32 %v1670_v5, %v607_v44 }
  0xc3   : > { %1097 = vst [vmem:[%s1693_s24 + $0x398] sm:$0xff] %v841_v48  ;;  %v354_v48 = vld [vmem:[%s1658_s30 + $0x470] sm:$0xff]  ;;  %v610_v53 = vmul.f32 %v1665_v1, %v353_v45  ;;  %v865_v58 = vadd.f32 %v1670_v5, %v608_v47 }
  0xc4   : > { %1098 = vst [vmem:[%s1693_s24 + $0x3a0] sm:$0xff] %v842_v51  ;;  %v355_v51 = vld [vmem:[%s1658_s30 + $0x478] sm:$0xff]  ;;  %v611_v56 = vmul.f32 %v1665_v1, %v354_v48  ;;  %v866_v61 = vadd.f32 %v1670_v5, %v609_v50 }
  0xc5   : > { %1099 = vst [vmem:[%s1693_s24 + $0x3a8] sm:$0xff] %v843_v54  ;;  %v356_v54 = vld [vmem:[%s1658_s30 + $0x480] sm:$0xff]  ;;  %v612_v59 = vmul.f32 %v1665_v1, %v355_v51  ;;  %v867_v0 = vadd.f32 %v1670_v5, %v610_v53 }
  0xc6   : > { %1100 = vst [vmem:[%s1693_s24 + $0x3b0] sm:$0xff] %v844_v57  ;;  %v357_v57 = vld [vmem:[%s1658_s30 + $0x488] sm:$0xff]  ;;  %v613_v62 = vmul.f32 %v1665_v1, %v356_v54  ;;  %v868_v4 = vadd.f32 %v1670_v5, %v611_v56 }
  0xc7   : > { %1101 = vst [vmem:[%s1693_s24 + $0x3b8] sm:$0xff] %v845_v60  ;;  %v358_v60 = vld [vmem:[%s1658_s30 + $0x490] sm:$0xff]  ;;  %v614_v2 = vmul.f32 %v1665_v1, %v357_v57  ;;  %v869_v8 = vadd.f32 %v1670_v5, %v612_v59 }
  0xc8   : > { %1102 = vst [vmem:[%s1693_s24 + $0x3c0] sm:$0xff] %v846_v63  ;;  %v359_v63 = vld [vmem:[%s1658_s30 + $0x498] sm:$0xff]  ;;  %v615_v6 = vmul.f32 %v1665_v1, %v358_v60  ;;  %v870_v11 = vadd.f32 %v1670_v5, %v613_v62 }
  0xc9   : > { %1103 = vst [vmem:[%s1693_s24 + $0x3c8] sm:$0xff] %v847_v3  ;;  %v360_v3 = vld [vmem:[%s1658_s30 + $0x4a0] sm:$0xff]  ;;  %v616_v9 = vmul.f32 %v1665_v1, %v359_v63  ;;  %v871_v14 = vadd.f32 %v1670_v5, %v614_v2 }
  0xca   : > { %1104 = vst [vmem:[%s1693_s24 + $0x3d0] sm:$0xff] %v848_v7  ;;  %v361_v7 = vld [vmem:[%s1658_s30 + $0x4a8] sm:$0xff]  ;;  %v617_v12 = vmul.f32 %v1665_v1, %v360_v3  ;;  %v872_v17 = vadd.f32 %v1670_v5, %v615_v6 }
  0xcb   : > { %1105 = vst [vmem:[%s1693_s24 + $0x3d8] sm:$0xff] %v849_v10  ;;  %v362_v10 = vld [vmem:[%s1658_s30 + $0x4b0] sm:$0xff]  ;;  %v618_v15 = vmul.f32 %v1665_v1, %v361_v7  ;;  %v873_v20 = vadd.f32 %v1670_v5, %v616_v9 }
  0xcc   : > { %1106 = vst [vmem:[%s1693_s24 + $0x3e0] sm:$0xff] %v850_v13  ;;  %v363_v13 = vld [vmem:[%s1658_s30 + $0x4b8] sm:$0xff]  ;;  %v619_v18 = vmul.f32 %v1665_v1, %v362_v10  ;;  %v874_v23 = vadd.f32 %v1670_v5, %v617_v12 }
  0xcd   : > { %1107 = vst [vmem:[%s1693_s24 + $0x3e8] sm:$0xff] %v851_v16  ;;  %v364_v16 = vld [vmem:[%s1658_s30 + $0x4c0] sm:$0xff]  ;;  %v620_v21 = vmul.f32 %v1665_v1, %v363_v13  ;;  %v875_v26 = vadd.f32 %v1670_v5, %v618_v15 }
  0xce   : > { %1108 = vst [vmem:[%s1693_s24 + $0x3f0] sm:$0xff] %v852_v19  ;;  %v365_v19 = vld [vmem:[%s1658_s30 + $0x4c8] sm:$0xff]  ;;  %v621_v24 = vmul.f32 %v1665_v1, %v364_v16  ;;  %v876_v29 = vadd.f32 %v1670_v5, %v619_v18 }
  0xcf   : > { %1109 = vst [vmem:[%s1693_s24 + $0x3f8] sm:$0xff] %v853_v22  ;;  %v366_v22 = vld [vmem:[%s1658_s30 + $0x4d0] sm:$0xff]  ;;  %v622_v27 = vmul.f32 %v1665_v1, %v365_v19  ;;  %v877_v32 = vadd.f32 %v1670_v5, %v620_v21 }
  0xd0   : > { %1110 = vst [vmem:[%s1693_s24 + $0x400] sm:$0xff] %v854_v25  ;;  %v367_v25 = vld [vmem:[%s1658_s30 + $0x4d8] sm:$0xff]  ;;  %v623_v30 = vmul.f32 %v1665_v1, %v366_v22  ;;  %v878_v35 = vadd.f32 %v1670_v5, %v621_v24 }
  0xd1   : > { %1111 = vst [vmem:[%s1693_s24 + $0x408] sm:$0xff] %v855_v28  ;;  %v368_v28 = vld [vmem:[%s1658_s30 + $0x4e0] sm:$0xff]  ;;  %v624_v33 = vmul.f32 %v1665_v1, %v367_v25  ;;  %v879_v38 = vadd.f32 %v1670_v5, %v622_v27 }
  0xd2   : > { %1112 = vst [vmem:[%s1693_s24 + $0x410] sm:$0xff] %v856_v31  ;;  %v369_v31 = vld [vmem:[%s1658_s30 + $0x4e8] sm:$0xff]  ;;  %v625_v36 = vmul.f32 %v1665_v1, %v368_v28  ;;  %v880_v41 = vadd.f32 %v1670_v5, %v623_v30 }
  0xd3   : > { %1113 = vst [vmem:[%s1693_s24 + $0x418] sm:$0xff] %v857_v34  ;;  %v370_v34 = vld [vmem:[%s1658_s30 + $0x4f0] sm:$0xff]  ;;  %v626_v39 = vmul.f32 %v1665_v1, %v369_v31  ;;  %v881_v44 = vadd.f32 %v1670_v5, %v624_v33 }
  0xd4   : > { %1114 = vst [vmem:[%s1693_s24 + $0x420] sm:$0xff] %v858_v37  ;;  %v371_v37 = vld [vmem:[%s1658_s30 + $0x4f8] sm:$0xff]  ;;  %v627_v42 = vmul.f32 %v1665_v1, %v370_v34  ;;  %v882_v47 = vadd.f32 %v1670_v5, %v625_v36 }
  0xd5   : > { %1115 = vst [vmem:[%s1693_s24 + $0x428] sm:$0xff] %v859_v40  ;;  %v372_v40 = vld [vmem:[%s1658_s30 + $0x500] sm:$0xff]  ;;  %v628_v45 = vmul.f32 %v1665_v1, %v371_v37  ;;  %v883_v50 = vadd.f32 %v1670_v5, %v626_v39 }
  0xd6   : > { %1116 = vst [vmem:[%s1693_s24 + $0x430] sm:$0xff] %v860_v43  ;;  %v373_v43 = vld [vmem:[%s1658_s30 + $0x508] sm:$0xff]  ;;  %v629_v48 = vmul.f32 %v1665_v1, %v372_v40  ;;  %v884_v53 = vadd.f32 %v1670_v5, %v627_v42 }
  0xd7   : > { %1117 = vst [vmem:[%s1693_s24 + $0x438] sm:$0xff] %v861_v46  ;;  %v374_v46 = vld [vmem:[%s1658_s30 + $0x510] sm:$0xff]  ;;  %v630_v51 = vmul.f32 %v1665_v1, %v373_v43  ;;  %v885_v56 = vadd.f32 %v1670_v5, %v628_v45 }
  0xd8   : > { %1118 = vst [vmem:[%s1693_s24 + $0x440] sm:$0xff] %v862_v49  ;;  %v375_v49 = vld [vmem:[%s1658_s30 + $0x518] sm:$0xff]  ;;  %v631_v54 = vmul.f32 %v1665_v1, %v374_v46  ;;  %v886_v59 = vadd.f32 %v1670_v5, %v629_v48 }
  0xd9   : > { %1119 = vst [vmem:[%s1693_s24 + $0x448] sm:$0xff] %v863_v52  ;;  %v376_v52 = vld [vmem:[%s1658_s30 + $0x520] sm:$0xff]  ;;  %v632_v57 = vmul.f32 %v1665_v1, %v375_v49  ;;  %v887_v62 = vadd.f32 %v1670_v5, %v630_v51 }
  0xda   : > { %1120 = vst [vmem:[%s1693_s24 + $0x450] sm:$0xff] %v864_v55  ;;  %v377_v55 = vld [vmem:[%s1658_s30 + $0x528] sm:$0xff]  ;;  %v633_v60 = vmul.f32 %v1665_v1, %v376_v52  ;;  %v888_v2 = vadd.f32 %v1670_v5, %v631_v54 }
  0xdb   : > { %1121 = vst [vmem:[%s1693_s24 + $0x458] sm:$0xff] %v865_v58  ;;  %v378_v58 = vld [vmem:[%s1658_s30 + $0x530] sm:$0xff]  ;;  %v634_v63 = vmul.f32 %v1665_v1, %v377_v55  ;;  %v889_v6 = vadd.f32 %v1670_v5, %v632_v57 }
  0xdc   : > { %1122 = vst [vmem:[%s1693_s24 + $0x460] sm:$0xff] %v866_v61  ;;  %v379_v61 = vld [vmem:[%s1658_s30 + $0x538] sm:$0xff]  ;;  %v635_v3 = vmul.f32 %v1665_v1, %v378_v58  ;;  %v890_v9 = vadd.f32 %v1670_v5, %v633_v60 }
  0xdd   : > { %1123 = vst [vmem:[%s1693_s24 + $0x468] sm:$0xff] %v867_v0  ;;  %v380_v0 = vld [vmem:[%s1658_s30 + $0x540] sm:$0xff]  ;;  %v636_v7 = vmul.f32 %v1665_v1, %v379_v61  ;;  %v891_v12 = vadd.f32 %v1670_v5, %v634_v63 }
  0xde   : > { %1124 = vst [vmem:[%s1693_s24 + $0x470] sm:$0xff] %v868_v4  ;;  %v381_v4 = vld [vmem:[%s1658_s30 + $0x548] sm:$0xff]  ;;  %v637_v10 = vmul.f32 %v1665_v1, %v380_v0  ;;  %v892_v15 = vadd.f32 %v1670_v5, %v635_v3 }
  0xdf   : > { %1125 = vst [vmem:[%s1693_s24 + $0x478] sm:$0xff] %v869_v8  ;;  %v382_v8 = vld [vmem:[%s1658_s30 + $0x550] sm:$0xff]  ;;  %v638_v13 = vmul.f32 %v1665_v1, %v381_v4  ;;  %v893_v18 = vadd.f32 %v1670_v5, %v636_v7 }
  0xe0   : > { %1126 = vst [vmem:[%s1693_s24 + $0x480] sm:$0xff] %v870_v11  ;;  %v383_v11 = vld [vmem:[%s1658_s30 + $0x558] sm:$0xff]  ;;  %v639_v16 = vmul.f32 %v1665_v1, %v382_v8  ;;  %v894_v21 = vadd.f32 %v1670_v5, %v637_v10 }
  0xe1   : > { %1127 = vst [vmem:[%s1693_s24 + $0x488] sm:$0xff] %v871_v14  ;;  %v384_v14 = vld [vmem:[%s1658_s30 + $0x560] sm:$0xff]  ;;  %v640_v19 = vmul.f32 %v1665_v1, %v383_v11  ;;  %v895_v24 = vadd.f32 %v1670_v5, %v638_v13 }
  0xe2   : > { %1128 = vst [vmem:[%s1693_s24 + $0x490] sm:$0xff] %v872_v17  ;;  %v385_v17 = vld [vmem:[%s1658_s30 + $0x568] sm:$0xff]  ;;  %v641_v22 = vmul.f32 %v1665_v1, %v384_v14  ;;  %v896_v27 = vadd.f32 %v1670_v5, %v639_v16 }
  0xe3   : > { %1129 = vst [vmem:[%s1693_s24 + $0x498] sm:$0xff] %v873_v20  ;;  %v386_v20 = vld [vmem:[%s1658_s30 + $0x570] sm:$0xff]  ;;  %v642_v25 = vmul.f32 %v1665_v1, %v385_v17  ;;  %v897_v30 = vadd.f32 %v1670_v5, %v640_v19 }
  0xe4   : > { %1130 = vst [vmem:[%s1693_s24 + $0x4a0] sm:$0xff] %v874_v23  ;;  %v387_v23 = vld [vmem:[%s1658_s30 + $0x578] sm:$0xff]  ;;  %v643_v28 = vmul.f32 %v1665_v1, %v386_v20  ;;  %v898_v33 = vadd.f32 %v1670_v5, %v641_v22 }
  0xe5   : > { %1131 = vst [vmem:[%s1693_s24 + $0x4a8] sm:$0xff] %v875_v26  ;;  %v388_v26 = vld [vmem:[%s1658_s30 + $0x580] sm:$0xff]  ;;  %v644_v31 = vmul.f32 %v1665_v1, %v387_v23  ;;  %v899_v36 = vadd.f32 %v1670_v5, %v642_v25 }
  0xe6   : > { %1132 = vst [vmem:[%s1693_s24 + $0x4b0] sm:$0xff] %v876_v29  ;;  %v389_v29 = vld [vmem:[%s1658_s30 + $0x588] sm:$0xff]  ;;  %v645_v34 = vmul.f32 %v1665_v1, %v388_v26  ;;  %v900_v39 = vadd.f32 %v1670_v5, %v643_v28 }
  0xe7   : > { %1133 = vst [vmem:[%s1693_s24 + $0x4b8] sm:$0xff] %v877_v32  ;;  %v390_v32 = vld [vmem:[%s1658_s30 + $0x590] sm:$0xff]  ;;  %v646_v37 = vmul.f32 %v1665_v1, %v389_v29  ;;  %v901_v42 = vadd.f32 %v1670_v5, %v644_v31 }
  0xe8   : > { %1134 = vst [vmem:[%s1693_s24 + $0x4c0] sm:$0xff] %v878_v35  ;;  %v391_v35 = vld [vmem:[%s1658_s30 + $0x598] sm:$0xff]  ;;  %v647_v40 = vmul.f32 %v1665_v1, %v390_v32  ;;  %v902_v45 = vadd.f32 %v1670_v5, %v645_v34 }
  0xe9   : > { %1135 = vst [vmem:[%s1693_s24 + $0x4c8] sm:$0xff] %v879_v38  ;;  %v392_v38 = vld [vmem:[%s1658_s30 + $0x5a0] sm:$0xff]  ;;  %v648_v43 = vmul.f32 %v1665_v1, %v391_v35  ;;  %v903_v48 = vadd.f32 %v1670_v5, %v646_v37 }
  0xea   : > { %1136 = vst [vmem:[%s1693_s24 + $0x4d0] sm:$0xff] %v880_v41  ;;  %v393_v41 = vld [vmem:[%s1658_s30 + $0x5a8] sm:$0xff]  ;;  %v649_v46 = vmul.f32 %v1665_v1, %v392_v38  ;;  %v904_v51 = vadd.f32 %v1670_v5, %v647_v40 }
  0xeb   : > { %1137 = vst [vmem:[%s1693_s24 + $0x4d8] sm:$0xff] %v881_v44  ;;  %v394_v44 = vld [vmem:[%s1658_s30 + $0x5b0] sm:$0xff]  ;;  %v650_v49 = vmul.f32 %v1665_v1, %v393_v41  ;;  %v905_v54 = vadd.f32 %v1670_v5, %v648_v43 }
  0xec   : > { %1138 = vst [vmem:[%s1693_s24 + $0x4e0] sm:$0xff] %v882_v47  ;;  %v395_v47 = vld [vmem:[%s1658_s30 + $0x5b8] sm:$0xff]  ;;  %v651_v52 = vmul.f32 %v1665_v1, %v394_v44  ;;  %v906_v57 = vadd.f32 %v1670_v5, %v649_v46 }
  0xed   : > { %1139 = vst [vmem:[%s1693_s24 + $0x4e8] sm:$0xff] %v883_v50  ;;  %v396_v50 = vld [vmem:[%s1658_s30 + $0x5c0] sm:$0xff]  ;;  %v652_v55 = vmul.f32 %v1665_v1, %v395_v47  ;;  %v907_v60 = vadd.f32 %v1670_v5, %v650_v49 }
  0xee   : > { %1140 = vst [vmem:[%s1693_s24 + $0x4f0] sm:$0xff] %v884_v53  ;;  %v397_v53 = vld [vmem:[%s1658_s30 + $0x5c8] sm:$0xff]  ;;  %v653_v58 = vmul.f32 %v1665_v1, %v396_v50  ;;  %v908_v63 = vadd.f32 %v1670_v5, %v651_v52 }
  0xef   : > { %1141 = vst [vmem:[%s1693_s24 + $0x4f8] sm:$0xff] %v885_v56  ;;  %v398_v56 = vld [vmem:[%s1658_s30 + $0x5d0] sm:$0xff]  ;;  %v654_v61 = vmul.f32 %v1665_v1, %v397_v53  ;;  %v909_v3 = vadd.f32 %v1670_v5, %v652_v55 }
  0xf0   : > { %1142 = vst [vmem:[%s1693_s24 + $0x500] sm:$0xff] %v886_v59  ;;  %v399_v59 = vld [vmem:[%s1658_s30 + $0x5d8] sm:$0xff]  ;;  %v655_v0 = vmul.f32 %v1665_v1, %v398_v56  ;;  %v910_v7 = vadd.f32 %v1670_v5, %v653_v58 }
  0xf1   : > { %1143 = vst [vmem:[%s1693_s24 + $0x508] sm:$0xff] %v887_v62  ;;  %v400_v62 = vld [vmem:[%s1658_s30 + $0x5e0] sm:$0xff]  ;;  %v656_v4 = vmul.f32 %v1665_v1, %v399_v59  ;;  %v911_v10 = vadd.f32 %v1670_v5, %v654_v61 }
  0xf2   : > { %1144 = vst [vmem:[%s1693_s24 + $0x510] sm:$0xff] %v888_v2  ;;  %v401_v2 = vld [vmem:[%s1658_s30 + $0x5e8] sm:$0xff]  ;;  %v657_v8 = vmul.f32 %v1665_v1, %v400_v62  ;;  %v912_v13 = vadd.f32 %v1670_v5, %v655_v0 }
  0xf3   : > { %1145 = vst [vmem:[%s1693_s24 + $0x518] sm:$0xff] %v889_v6  ;;  %v402_v6 = vld [vmem:[%s1658_s30 + $0x5f0] sm:$0xff]  ;;  %v658_v11 = vmul.f32 %v1665_v1, %v401_v2  ;;  %v913_v16 = vadd.f32 %v1670_v5, %v656_v4 }
  0xf4   : > { %1146 = vst [vmem:[%s1693_s24 + $0x520] sm:$0xff] %v890_v9  ;;  %v403_v9 = vld [vmem:[%s1658_s30 + $0x5f8] sm:$0xff]  ;;  %v659_v14 = vmul.f32 %v1665_v1, %v402_v6  ;;  %v914_v19 = vadd.f32 %v1670_v5, %v657_v8 }
  0xf5   : > { %1147 = vst [vmem:[%s1693_s24 + $0x528] sm:$0xff] %v891_v12  ;;  %v404_v12 = vld [vmem:[%s1658_s30 + $0x600] sm:$0xff]  ;;  %v660_v17 = vmul.f32 %v1665_v1, %v403_v9  ;;  %v915_v22 = vadd.f32 %v1670_v5, %v658_v11 }
  0xf6   : > { %1148 = vst [vmem:[%s1693_s24 + $0x530] sm:$0xff] %v892_v15  ;;  %v405_v15 = vld [vmem:[%s1658_s30 + $0x608] sm:$0xff]  ;;  %v661_v20 = vmul.f32 %v1665_v1, %v404_v12  ;;  %v916_v25 = vadd.f32 %v1670_v5, %v659_v14 }
  0xf7   : > { %1149 = vst [vmem:[%s1693_s24 + $0x538] sm:$0xff] %v893_v18  ;;  %v406_v18 = vld [vmem:[%s1658_s30 + $0x610] sm:$0xff]  ;;  %v662_v23 = vmul.f32 %v1665_v1, %v405_v15  ;;  %v917_v28 = vadd.f32 %v1670_v5, %v660_v17 }
  0xf8   : > { %1150 = vst [vmem:[%s1693_s24 + $0x540] sm:$0xff] %v894_v21  ;;  %v407_v21 = vld [vmem:[%s1658_s30 + $0x618] sm:$0xff]  ;;  %v663_v26 = vmul.f32 %v1665_v1, %v406_v18  ;;  %v918_v31 = vadd.f32 %v1670_v5, %v661_v20 }
  0xf9   : > { %1151 = vst [vmem:[%s1693_s24 + $0x548] sm:$0xff] %v895_v24  ;;  %v408_v24 = vld [vmem:[%s1658_s30 + $0x620] sm:$0xff]  ;;  %v664_v29 = vmul.f32 %v1665_v1, %v407_v21  ;;  %v919_v34 = vadd.f32 %v1670_v5, %v662_v23 }
  0xfa   : > { %1152 = vst [vmem:[%s1693_s24 + $0x550] sm:$0xff] %v896_v27  ;;  %v409_v27 = vld [vmem:[%s1658_s30 + $0x628] sm:$0xff]  ;;  %v665_v32 = vmul.f32 %v1665_v1, %v408_v24  ;;  %v920_v37 = vadd.f32 %v1670_v5, %v663_v26 }
  0xfb   : > { %1153 = vst [vmem:[%s1693_s24 + $0x558] sm:$0xff] %v897_v30  ;;  %v410_v30 = vld [vmem:[%s1658_s30 + $0x630] sm:$0xff]  ;;  %v666_v35 = vmul.f32 %v1665_v1, %v409_v27  ;;  %v921_v40 = vadd.f32 %v1670_v5, %v664_v29 }
  0xfc   : > { %1154 = vst [vmem:[%s1693_s24 + $0x560] sm:$0xff] %v898_v33  ;;  %v411_v33 = vld [vmem:[%s1658_s30 + $0x638] sm:$0xff]  ;;  %v667_v38 = vmul.f32 %v1665_v1, %v410_v30  ;;  %v922_v43 = vadd.f32 %v1670_v5, %v665_v32 }
  0xfd   : > { %1155 = vst [vmem:[%s1693_s24 + $0x568] sm:$0xff] %v899_v36  ;;  %v412_v36 = vld [vmem:[%s1658_s30 + $0x640] sm:$0xff]  ;;  %v668_v41 = vmul.f32 %v1665_v1, %v411_v33  ;;  %v923_v46 = vadd.f32 %v1670_v5, %v666_v35 }
  0xfe   : > { %1156 = vst [vmem:[%s1693_s24 + $0x570] sm:$0xff] %v900_v39  ;;  %v413_v39 = vld [vmem:[%s1658_s30 + $0x648] sm:$0xff]  ;;  %v669_v44 = vmul.f32 %v1665_v1, %v412_v36  ;;  %v924_v49 = vadd.f32 %v1670_v5, %v667_v38 }
  0xff   : > { %1157 = vst [vmem:[%s1693_s24 + $0x578] sm:$0xff] %v901_v42  ;;  %v414_v42 = vld [vmem:[%s1658_s30 + $0x650] sm:$0xff]  ;;  %v670_v47 = vmul.f32 %v1665_v1, %v413_v39  ;;  %v925_v52 = vadd.f32 %v1670_v5, %v668_v41 }
 0x100   : > { %1158 = vst [vmem:[%s1693_s24 + $0x580] sm:$0xff] %v902_v45  ;;  %v415_v45 = vld [vmem:[%s1658_s30 + $0x658] sm:$0xff]  ;;  %v671_v50 = vmul.f32 %v1665_v1, %v414_v42  ;;  %v926_v55 = vadd.f32 %v1670_v5, %v669_v44 }
 0x101   : > { %1159 = vst [vmem:[%s1693_s24 + $0x588] sm:$0xff] %v903_v48  ;;  %v416_v48 = vld [vmem:[%s1658_s30 + $0x660] sm:$0xff]  ;;  %v672_v53 = vmul.f32 %v1665_v1, %v415_v45  ;;  %v927_v58 = vadd.f32 %v1670_v5, %v670_v47 }
 0x102   : > { %1160 = vst [vmem:[%s1693_s24 + $0x590] sm:$0xff] %v904_v51  ;;  %v417_v51 = vld [vmem:[%s1658_s30 + $0x668] sm:$0xff]  ;;  %v673_v56 = vmul.f32 %v1665_v1, %v416_v48  ;;  %v928_v61 = vadd.f32 %v1670_v5, %v671_v50 }
 0x103   : > { %1161 = vst [vmem:[%s1693_s24 + $0x598] sm:$0xff] %v905_v54  ;;  %v418_v54 = vld [vmem:[%s1658_s30 + $0x670] sm:$0xff]  ;;  %v674_v59 = vmul.f32 %v1665_v1, %v417_v51  ;;  %v929_v0 = vadd.f32 %v1670_v5, %v672_v53 }
 0x104   : > { %1162 = vst [vmem:[%s1693_s24 + $0x5a0] sm:$0xff] %v906_v57  ;;  %v419_v57 = vld [vmem:[%s1658_s30 + $0x678] sm:$0xff]  ;;  %v675_v62 = vmul.f32 %v1665_v1, %v418_v54  ;;  %v930_v4 = vadd.f32 %v1670_v5, %v673_v56 }
 0x105   : > { %1163 = vst [vmem:[%s1693_s24 + $0x5a8] sm:$0xff] %v907_v60  ;;  %v420_v60 = vld [vmem:[%s1658_s30 + $0x680] sm:$0xff]  ;;  %v676_v2 = vmul.f32 %v1665_v1, %v419_v57  ;;  %v931_v8 = vadd.f32 %v1670_v5, %v674_v59 }
 0x106   : > { %1164 = vst [vmem:[%s1693_s24 + $0x5b0] sm:$0xff] %v908_v63  ;;  %v421_v63 = vld [vmem:[%s1658_s30 + $0x688] sm:$0xff]  ;;  %v677_v6 = vmul.f32 %v1665_v1, %v420_v60  ;;  %v932_v11 = vadd.f32 %v1670_v5, %v675_v62 }
 0x107   : > { %1165 = vst [vmem:[%s1693_s24 + $0x5b8] sm:$0xff] %v909_v3  ;;  %v422_v3 = vld [vmem:[%s1658_s30 + $0x690] sm:$0xff]  ;;  %v678_v9 = vmul.f32 %v1665_v1, %v421_v63  ;;  %v933_v14 = vadd.f32 %v1670_v5, %v676_v2 }
 0x108   : > { %1166 = vst [vmem:[%s1693_s24 + $0x5c0] sm:$0xff] %v910_v7  ;;  %v423_v7 = vld [vmem:[%s1658_s30 + $0x698] sm:$0xff]  ;;  %v679_v12 = vmul.f32 %v1665_v1, %v422_v3  ;;  %v934_v17 = vadd.f32 %v1670_v5, %v677_v6 }
 0x109   : > { %1167 = vst [vmem:[%s1693_s24 + $0x5c8] sm:$0xff] %v911_v10  ;;  %v424_v10 = vld [vmem:[%s1658_s30 + $0x6a0] sm:$0xff]  ;;  %v680_v15 = vmul.f32 %v1665_v1, %v423_v7  ;;  %v935_v20 = vadd.f32 %v1670_v5, %v678_v9 }
 0x10a   : > { %1168 = vst [vmem:[%s1693_s24 + $0x5d0] sm:$0xff] %v912_v13  ;;  %v425_v13 = vld [vmem:[%s1658_s30 + $0x6a8] sm:$0xff]  ;;  %v681_v18 = vmul.f32 %v1665_v1, %v424_v10  ;;  %v936_v23 = vadd.f32 %v1670_v5, %v679_v12 }
 0x10b   : > { %1169 = vst [vmem:[%s1693_s24 + $0x5d8] sm:$0xff] %v913_v16  ;;  %v426_v16 = vld [vmem:[%s1658_s30 + $0x6b0] sm:$0xff]  ;;  %v682_v21 = vmul.f32 %v1665_v1, %v425_v13  ;;  %v937_v26 = vadd.f32 %v1670_v5, %v680_v15 }
 0x10c   : > { %1170 = vst [vmem:[%s1693_s24 + $0x5e0] sm:$0xff] %v914_v19  ;;  %v427_v19 = vld [vmem:[%s1658_s30 + $0x6b8] sm:$0xff]  ;;  %v683_v24 = vmul.f32 %v1665_v1, %v426_v16  ;;  %v938_v29 = vadd.f32 %v1670_v5, %v681_v18 }
 0x10d   : > { %1171 = vst [vmem:[%s1693_s24 + $0x5e8] sm:$0xff] %v915_v22  ;;  %v428_v22 = vld [vmem:[%s1658_s30 + $0x6c0] sm:$0xff]  ;;  %v684_v27 = vmul.f32 %v1665_v1, %v427_v19  ;;  %v939_v32 = vadd.f32 %v1670_v5, %v682_v21 }
 0x10e   : > { %1172 = vst [vmem:[%s1693_s24 + $0x5f0] sm:$0xff] %v916_v25  ;;  %v429_v25 = vld [vmem:[%s1658_s30 + $0x6c8] sm:$0xff]  ;;  %v685_v30 = vmul.f32 %v1665_v1, %v428_v22  ;;  %v940_v35 = vadd.f32 %v1670_v5, %v683_v24 }
 0x10f   : > { %1173 = vst [vmem:[%s1693_s24 + $0x5f8] sm:$0xff] %v917_v28  ;;  %v430_v28 = vld [vmem:[%s1658_s30 + $0x6d0] sm:$0xff]  ;;  %v686_v33 = vmul.f32 %v1665_v1, %v429_v25  ;;  %v941_v38 = vadd.f32 %v1670_v5, %v684_v27 }
 0x110   : > { %1174 = vst [vmem:[%s1693_s24 + $0x600] sm:$0xff] %v918_v31  ;;  %v431_v31 = vld [vmem:[%s1658_s30 + $0x6d8] sm:$0xff]  ;;  %v687_v36 = vmul.f32 %v1665_v1, %v430_v28  ;;  %v942_v41 = vadd.f32 %v1670_v5, %v685_v30 }
 0x111   : > { %1175 = vst [vmem:[%s1693_s24 + $0x608] sm:$0xff] %v919_v34  ;;  %v432_v34 = vld [vmem:[%s1658_s30 + $0x6e0] sm:$0xff]  ;;  %v688_v39 = vmul.f32 %v1665_v1, %v431_v31  ;;  %v943_v44 = vadd.f32 %v1670_v5, %v686_v33 }
 0x112   : > { %1176 = vst [vmem:[%s1693_s24 + $0x610] sm:$0xff] %v920_v37  ;;  %v433_v37 = vld [vmem:[%s1658_s30 + $0x6e8] sm:$0xff]  ;;  %v689_v42 = vmul.f32 %v1665_v1, %v432_v34  ;;  %v944_v47 = vadd.f32 %v1670_v5, %v687_v36 }
 0x113   : > { %1177 = vst [vmem:[%s1693_s24 + $0x618] sm:$0xff] %v921_v40  ;;  %v434_v40 = vld [vmem:[%s1658_s30 + $0x6f0] sm:$0xff]  ;;  %v690_v45 = vmul.f32 %v1665_v1, %v433_v37  ;;  %v945_v50 = vadd.f32 %v1670_v5, %v688_v39 }
 0x114   : > { %1178 = vst [vmem:[%s1693_s24 + $0x620] sm:$0xff] %v922_v43  ;;  %v435_v43 = vld [vmem:[%s1658_s30 + $0x6f8] sm:$0xff]  ;;  %v691_v48 = vmul.f32 %v1665_v1, %v434_v40  ;;  %v946_v53 = vadd.f32 %v1670_v5, %v689_v42 }
 0x115   : > { %1179 = vst [vmem:[%s1693_s24 + $0x628] sm:$0xff] %v923_v46  ;;  %v436_v46 = vld [vmem:[%s1658_s30 + $0x700] sm:$0xff]  ;;  %v692_v51 = vmul.f32 %v1665_v1, %v435_v43  ;;  %v947_v56 = vadd.f32 %v1670_v5, %v690_v45 }
 0x116   : > { %1180 = vst [vmem:[%s1693_s24 + $0x630] sm:$0xff] %v924_v49  ;;  %v437_v49 = vld [vmem:[%s1658_s30 + $0x708] sm:$0xff]  ;;  %v693_v54 = vmul.f32 %v1665_v1, %v436_v46  ;;  %v948_v59 = vadd.f32 %v1670_v5, %v691_v48 }
 0x117   : > { %1181 = vst [vmem:[%s1693_s24 + $0x638] sm:$0xff] %v925_v52  ;;  %v438_v52 = vld [vmem:[%s1658_s30 + $0x710] sm:$0xff]  ;;  %v694_v57 = vmul.f32 %v1665_v1, %v437_v49  ;;  %v949_v62 = vadd.f32 %v1670_v5, %v692_v51 }
 0x118   : > { %1182 = vst [vmem:[%s1693_s24 + $0x640] sm:$0xff] %v926_v55  ;;  %v439_v55 = vld [vmem:[%s1658_s30 + $0x718] sm:$0xff]  ;;  %v695_v60 = vmul.f32 %v1665_v1, %v438_v52  ;;  %v950_v2 = vadd.f32 %v1670_v5, %v693_v54 }
 0x119   : > { %1183 = vst [vmem:[%s1693_s24 + $0x648] sm:$0xff] %v927_v58  ;;  %v440_v58 = vld [vmem:[%s1658_s30 + $0x720] sm:$0xff]  ;;  %v696_v63 = vmul.f32 %v1665_v1, %v439_v55  ;;  %v951_v6 = vadd.f32 %v1670_v5, %v694_v57 }
 0x11a   : > { %1184 = vst [vmem:[%s1693_s24 + $0x650] sm:$0xff] %v928_v61  ;;  %v441_v61 = vld [vmem:[%s1658_s30 + $0x728] sm:$0xff]  ;;  %v697_v3 = vmul.f32 %v1665_v1, %v440_v58  ;;  %v952_v9 = vadd.f32 %v1670_v5, %v695_v60 }
 0x11b   : > { %1185 = vst [vmem:[%s1693_s24 + $0x658] sm:$0xff] %v929_v0  ;;  %v442_v0 = vld [vmem:[%s1658_s30 + $0x730] sm:$0xff]  ;;  %v698_v7 = vmul.f32 %v1665_v1, %v441_v61  ;;  %v953_v12 = vadd.f32 %v1670_v5, %v696_v63 }
 0x11c   : > { %1186 = vst [vmem:[%s1693_s24 + $0x660] sm:$0xff] %v930_v4  ;;  %v443_v4 = vld [vmem:[%s1658_s30 + $0x738] sm:$0xff]  ;;  %v699_v10 = vmul.f32 %v1665_v1, %v442_v0  ;;  %v954_v15 = vadd.f32 %v1670_v5, %v697_v3 }
 0x11d   : > { %1187 = vst [vmem:[%s1693_s24 + $0x668] sm:$0xff] %v931_v8  ;;  %v444_v8 = vld [vmem:[%s1658_s30 + $0x740] sm:$0xff]  ;;  %v700_v13 = vmul.f32 %v1665_v1, %v443_v4  ;;  %v955_v18 = vadd.f32 %v1670_v5, %v698_v7 }
 0x11e   : > { %1188 = vst [vmem:[%s1693_s24 + $0x670] sm:$0xff] %v932_v11  ;;  %v445_v11 = vld [vmem:[%s1658_s30 + $0x748] sm:$0xff]  ;;  %v701_v16 = vmul.f32 %v1665_v1, %v444_v8  ;;  %v956_v21 = vadd.f32 %v1670_v5, %v699_v10 }
 0x11f   : > { %1189 = vst [vmem:[%s1693_s24 + $0x678] sm:$0xff] %v933_v14  ;;  %v446_v14 = vld [vmem:[%s1658_s30 + $0x750] sm:$0xff]  ;;  %v702_v19 = vmul.f32 %v1665_v1, %v445_v11  ;;  %v957_v24 = vadd.f32 %v1670_v5, %v700_v13 }
 0x120   : > { %1190 = vst [vmem:[%s1693_s24 + $0x680] sm:$0xff] %v934_v17  ;;  %v447_v17 = vld [vmem:[%s1658_s30 + $0x758] sm:$0xff]  ;;  %v703_v22 = vmul.f32 %v1665_v1, %v446_v14  ;;  %v958_v27 = vadd.f32 %v1670_v5, %v701_v16 }
 0x121   : > { %1191 = vst [vmem:[%s1693_s24 + $0x688] sm:$0xff] %v935_v20  ;;  %v448_v20 = vld [vmem:[%s1658_s30 + $0x760] sm:$0xff]  ;;  %v704_v25 = vmul.f32 %v1665_v1, %v447_v17  ;;  %v959_v30 = vadd.f32 %v1670_v5, %v702_v19 }
 0x122   : > { %1192 = vst [vmem:[%s1693_s24 + $0x690] sm:$0xff] %v936_v23  ;;  %v449_v23 = vld [vmem:[%s1658_s30 + $0x768] sm:$0xff]  ;;  %v705_v28 = vmul.f32 %v1665_v1, %v448_v20  ;;  %v960_v33 = vadd.f32 %v1670_v5, %v703_v22 }
 0x123   : > { %1193 = vst [vmem:[%s1693_s24 + $0x698] sm:$0xff] %v937_v26  ;;  %v450_v26 = vld [vmem:[%s1658_s30 + $0x770] sm:$0xff]  ;;  %v706_v31 = vmul.f32 %v1665_v1, %v449_v23  ;;  %v961_v36 = vadd.f32 %v1670_v5, %v704_v25 }
 0x124   : > { %1194 = vst [vmem:[%s1693_s24 + $0x6a0] sm:$0xff] %v938_v29  ;;  %v451_v29 = vld [vmem:[%s1658_s30 + $0x778] sm:$0xff]  ;;  %v707_v34 = vmul.f32 %v1665_v1, %v450_v26  ;;  %v962_v39 = vadd.f32 %v1670_v5, %v705_v28 }
 0x125   : > { %1195 = vst [vmem:[%s1693_s24 + $0x6a8] sm:$0xff] %v939_v32  ;;  %v452_v32 = vld [vmem:[%s1658_s30 + $0x780] sm:$0xff]  ;;  %v708_v37 = vmul.f32 %v1665_v1, %v451_v29  ;;  %v963_v42 = vadd.f32 %v1670_v5, %v706_v31 }
 0x126   : > { %1196 = vst [vmem:[%s1693_s24 + $0x6b0] sm:$0xff] %v940_v35  ;;  %v453_v35 = vld [vmem:[%s1658_s30 + $0x788] sm:$0xff]  ;;  %v709_v40 = vmul.f32 %v1665_v1, %v452_v32  ;;  %v964_v45 = vadd.f32 %v1670_v5, %v707_v34 }
 0x127   : > { %1197 = vst [vmem:[%s1693_s24 + $0x6b8] sm:$0xff] %v941_v38  ;;  %v454_v38 = vld [vmem:[%s1658_s30 + $0x790] sm:$0xff]  ;;  %v710_v43 = vmul.f32 %v1665_v1, %v453_v35  ;;  %v965_v48 = vadd.f32 %v1670_v5, %v708_v37 }
 0x128   : > { %1198 = vst [vmem:[%s1693_s24 + $0x6c0] sm:$0xff] %v942_v41  ;;  %v455_v41 = vld [vmem:[%s1658_s30 + $0x798] sm:$0xff]  ;;  %v711_v46 = vmul.f32 %v1665_v1, %v454_v38  ;;  %v966_v51 = vadd.f32 %v1670_v5, %v709_v40 }
 0x129   : > { %1199 = vst [vmem:[%s1693_s24 + $0x6c8] sm:$0xff] %v943_v44  ;;  %v456_v44 = vld [vmem:[%s1658_s30 + $0x7a0] sm:$0xff]  ;;  %v712_v49 = vmul.f32 %v1665_v1, %v455_v41  ;;  %v967_v54 = vadd.f32 %v1670_v5, %v710_v43 }
 0x12a   : > { %1200 = vst [vmem:[%s1693_s24 + $0x6d0] sm:$0xff] %v944_v47  ;;  %v457_v47 = vld [vmem:[%s1658_s30 + $0x7a8] sm:$0xff]  ;;  %v713_v52 = vmul.f32 %v1665_v1, %v456_v44  ;;  %v968_v57 = vadd.f32 %v1670_v5, %v711_v46 }
 0x12b   : > { %1201 = vst [vmem:[%s1693_s24 + $0x6d8] sm:$0xff] %v945_v50  ;;  %v458_v50 = vld [vmem:[%s1658_s30 + $0x7b0] sm:$0xff]  ;;  %v714_v55 = vmul.f32 %v1665_v1, %v457_v47  ;;  %v969_v60 = vadd.f32 %v1670_v5, %v712_v49 }
 0x12c   : > { %1202 = vst [vmem:[%s1693_s24 + $0x6e0] sm:$0xff] %v946_v53  ;;  %v459_v53 = vld [vmem:[%s1658_s30 + $0x7b8] sm:$0xff]  ;;  %v715_v58 = vmul.f32 %v1665_v1, %v458_v50  ;;  %v970_v63 = vadd.f32 %v1670_v5, %v713_v52 }
 0x12d   : > { %1203 = vst [vmem:[%s1693_s24 + $0x6e8] sm:$0xff] %v947_v56  ;;  %v460_v56 = vld [vmem:[%s1658_s30 + $0x7c0] sm:$0xff]  ;;  %v716_v61 = vmul.f32 %v1665_v1, %v459_v53  ;;  %v971_v3 = vadd.f32 %v1670_v5, %v714_v55 }
 0x12e   : > { %1204 = vst [vmem:[%s1693_s24 + $0x6f0] sm:$0xff] %v948_v59  ;;  %v461_v59 = vld [vmem:[%s1658_s30 + $0x7c8] sm:$0xff]  ;;  %v717_v0 = vmul.f32 %v1665_v1, %v460_v56  ;;  %v972_v7 = vadd.f32 %v1670_v5, %v715_v58 }
 0x12f   : > { %1205 = vst [vmem:[%s1693_s24 + $0x6f8] sm:$0xff] %v949_v62  ;;  %v462_v62 = vld [vmem:[%s1658_s30 + $0x7d0] sm:$0xff]  ;;  %v718_v4 = vmul.f32 %v1665_v1, %v461_v59  ;;  %v973_v10 = vadd.f32 %v1670_v5, %v716_v61 }
 0x130   : > { %1206 = vst [vmem:[%s1693_s24 + $0x700] sm:$0xff] %v950_v2  ;;  %v463_v2 = vld [vmem:[%s1658_s30 + $0x7d8] sm:$0xff]  ;;  %v719_v8 = vmul.f32 %v1665_v1, %v462_v62  ;;  %v974_v13 = vadd.f32 %v1670_v5, %v717_v0 }
 0x131   : > { %1207 = vst [vmem:[%s1693_s24 + $0x708] sm:$0xff] %v951_v6  ;;  %v464_v6 = vld [vmem:[%s1658_s30 + $0x7e0] sm:$0xff]  ;;  %v720_v11 = vmul.f32 %v1665_v1, %v463_v2  ;;  %v975_v16 = vadd.f32 %v1670_v5, %v718_v4 }
 0x132   : > { %1208 = vst [vmem:[%s1693_s24 + $0x710] sm:$0xff] %v952_v9  ;;  %v465_v9 = vld [vmem:[%s1658_s30 + $0x7e8] sm:$0xff]  ;;  %v721_v14 = vmul.f32 %v1665_v1, %v464_v6 }
 0x133   : > { %1209 = vst [vmem:[%s1693_s24 + $0x718] sm:$0xff] %v953_v12  ;;  %v466_v12 = vld [vmem:[%s1658_s30 + $0x7f0] sm:$0xff]  ;;  %v722_v17 = vmul.f32 %v1665_v1, %v465_v9  ;;  %v977_v20 = vadd.f32 %v1670_v5, %v720_v11 }
 0x134   : > { %1210 = vst [vmem:[%s1693_s24 + $0x720] sm:$0xff] %v954_v15  ;;  %v467_v15 = vld [vmem:[%s1658_s30 + $0x7f8] sm:$0xff]  ;;  %v723_v19 = vmul.f32 %v1665_v1, %v466_v12  ;;  %v978_v22 = vadd.f32 %v1670_v5, %v721_v14 }
 0x135   : > { %1211 = vst [vmem:[%s1693_s24 + $0x728] sm:$0xff] %v955_v18  ;;  %v976_v18 = vadd.f32 %v1670_v5, %v719_v8  ;;  %v979_v23 = vadd.f32 %v1670_v5, %v722_v17 }
 0x136   : > { %1212 = vst [vmem:[%s1693_s24 + $0x730] sm:$0xff] %v956_v21  ;;  %v724_v21 = vmul.f32 %v1665_v1, %v467_v15 }
 0x137   : > { %1213 = vst [vmem:[%s1693_s24 + $0x738] sm:$0xff] %v957_v24  ;;  %v980_v24 = vadd.f32 %v1670_v5, %v723_v19 }
 0x138   : > { %1214 = vst [vmem:[%s1693_s24 + $0x740] sm:$0xff] %v958_v27  ;;  %v981_v25 = vadd.f32 %v1670_v5, %v724_v21 }
 0x139   : > { %1215 = vst [vmem:[%s1693_s24 + $0x748] sm:$0xff] %v959_v30 }
 0x13a   : > { %1216 = vst [vmem:[%s1693_s24 + $0x750] sm:$0xff] %v960_v33 }
 0x13b   : > { %1217 = vst [vmem:[%s1693_s24 + $0x758] sm:$0xff] %v961_v36 }
 0x13c   : > { %1218 = vst [vmem:[%s1693_s24 + $0x760] sm:$0xff] %v962_v39 }
 0x13d   : > { %1219 = vst [vmem:[%s1693_s24 + $0x768] sm:$0xff] %v963_v42 }
 0x13e   : > { %1220 = vst [vmem:[%s1693_s24 + $0x770] sm:$0xff] %v964_v45 }
 0x13f   : > { %1221 = vst [vmem:[%s1693_s24 + $0x778] sm:$0xff] %v965_v48 }
 0x140   : > { %1222 = vst [vmem:[%s1693_s24 + $0x780] sm:$0xff] %v966_v51 }
 0x141   : > { %1223 = vst [vmem:[%s1693_s24 + $0x788] sm:$0xff] %v967_v54 }
 0x142   : > { %1224 = vst [vmem:[%s1693_s24 + $0x790] sm:$0xff] %v968_v57 }
 0x143   : > { %1225 = vst [vmem:[%s1693_s24 + $0x798] sm:$0xff] %v969_v60 }
 0x144   : > { %1226 = vst [vmem:[%s1693_s24 + $0x7a0] sm:$0xff] %v970_v63 }
 0x145   : > { %1227 = vst [vmem:[%s1693_s24 + $0x7a8] sm:$0xff] %v971_v3 }
 0x146   : > { %1228 = vst [vmem:[%s1693_s24 + $0x7b0] sm:$0xff] %v972_v7 }
 0x147   : > { %1229 = vst [vmem:[%s1693_s24 + $0x7b8] sm:$0xff] %v973_v10 }
 0x148   : > { %1230 = vst [vmem:[%s1693_s24 + $0x7c0] sm:$0xff] %v974_v13 }
 0x149   : > { %1231 = vst [vmem:[%s1693_s24 + $0x7c8] sm:$0xff] %v975_v16 }
 0x14a   : > { %1232 = vst [vmem:[%s1693_s24 + $0x7d0] sm:$0xff] %v976_v18 }
 0x14b   : > { %1233 = vst [vmem:[%s1693_s24 + $0x7d8] sm:$0xff] %v977_v20  ;;  %1245 = sbr.rel (!%p1595_p9) target bundleno = 367 (0x16f), region = 40 }
 0x14c   : > { %1234 = vst [vmem:[%s1693_s24 + $0x7e0] sm:$0xff] %v978_v22 }
 0x14d   : > { %1235 = vst [vmem:[%s1693_s24 + $0x7e8] sm:$0xff] %v979_v23 }
 0x14e   : > { %1236 = vst [vmem:[%s1693_s24 + $0x7f0] sm:$0xff] %v980_v24 }
 0x14f   : > { %1237 = vst [vmem:[%s1693_s24 + $0x7f8] sm:$0xff] %v981_v25 }
 0x150   : > { %s2774_s28 = smov (!%p1248_p6, %s1247_s28), 256 }
 0x151   : > { %s1349_s29 = sshll.u32 %s2774_s28, 3 }
 0x152   : > { %s1251_s4 = ssub.s32 2048, %s1349_s29 }
 0x153   : > { %s1252_s5 = sshll.u32 %s1251_s4, 4 }
 0x154   : > { %1253 = vsyncadd %s1239_s15, %s1252_s5  ;;  %p2705_p13 = scmp.ne.s32.totalorder %s1349_s29, 0  ;;  %s1357_s6 = sshll.u32 %s1572_s0, 11 }
 0x155   : > { %s1256_s11 = scalar_lea.hbm %s2761_s3, %s1357_s6  ;;  %s1258_s12 = sshll.u32 %s1693_s24, 4  ;;  %s2714_s12 = int_to_ptr.vmem [resolvable:$true] %s1258_s12 }
 0x156   : > { %s1260_s13 = sshll.u32 %s1256_s11, 4  ;;  %s1353_s21 = sshll.u32 %s2774_s28, 7  ;;  %s2716_s13 = int_to_ptr.hbm [resolvable:$true] %s1260_s13 }
 0x157   : > { %s1440_s27 = sshra.s32 %s2714_s12, 4  ;;  %s1442_s9 = sshrl.u32 %s1353_s21, 4  ;;  %s1441_s27 = int_to_ptr.vmem [resolvable:$true] %s1440_s27 }
 0x158   : > { %s1447_s30 = scalar_lea.vmem %s1441_s27, %s1442_s9  ;;  %s1522_s0 = smov [#allocation7]  }
 0x159   : > { %p1448_p9 = scmp.ne.s32.totalorder %s1441_s27, %s1447_s30  ;;  %s1451_s7 = scalar_lea.vmem %s1522_s0, 4096 }
 0x15a   : > { %p1453_p8 = scmp.lt.s32.totalorder %s1451_s7, %s1447_s30 }
 0x15b   : > { %p1449_p5 = pnand %p1448_p9, %p2705_p13 }
 0x15d   : > { %p1450_p7 = pneg %p1449_p5 }
 0x15f   : > { %p1455_p11 = pnand %p1453_p8, %p1450_p7 }
 0x161   : > { %1458 = shalt.err (!%p1455_p11)
}
 0x162   : > { %s1459_s14 = sshra.s32 %s2716_s13, 4  ;;  %s1470_s4 = scalar_lea.hbm %s2761_s3, 5000  ;;  %s1460_s14 = int_to_ptr.hbm [resolvable:$true] %s1459_s14 }
 0x163   : > { %s1466_s24 = scalar_lea.hbm %s1460_s14, %s1442_s9  ;;  %p1471_p2 = scmp.lt.s32.totalorder %s1460_s14, %s2761_s3 }
 0x164   : > { %p1467_p12 = scmp.ne.s32.totalorder %s1460_s14, %s1466_s24  ;;  %p1472_p3 = scmp.lt.s32.totalorder %s1470_s4, %s1466_s24 }
 0x166   : > { %p1468_p0 = pnand %p1467_p12, %p2705_p13  ;;  %p1473_p4 = por %p1472_p3, %p1471_p2 }
 0x168   : > { %p1469_p1 = pneg %p1468_p0 }
 0x16a   : > { %p1474_p6 = pnand %p1473_p4, %p1469_p1 }
 0x16c   : > { %1477 = shalt.err (!%p1474_p6)
}
 0x16d   : > { %s1523_s8 = smov 128   ;;  %s1524_s10 = smov 8  }
 0x16e   : > { %1266 = dma.vmem_to_hbm [thread:$0]  (%p2705_p13), %s2714_s12, %s1353_s21, %s2716_s13, %s1239_s15, %s1523_s8, %s1523_s8, %s1524_s10  }
 0x16f PF: > { %p1364_p9 = scmp.ge.s32.totalorder %s1517_s19, 2  ;;  %s1275_s11 = sand.u32 1, %s1505_s16  }
 0x170   : > { %s1276_s27 = scalar_lea.sflag [#allocation6], %s1275_s11 }
 0x171   : > { %p1361_p5 = pnand %p1364_p9, %p1599_p10 }
 0x173   : > { %p1362_p7 = pneg %p1361_p5 }
 0x175   : > { %1500 = dma.done.wait (%p1362_p7), %s1276_s27, 32768  }
 0x176   : > { %1502 = vsyncadd (%p1362_p7), %s1276_s27, 4294934528  ;;  %p18_p8 = scmp.ge.s32.totalorder %s1576_s20, 5   ;;  %s2767_s16 = smov %s1509_s17 }
 0x177   : > { %s2768_s17 = smov %s1513_s18  ;;  %s2769_s18 = smov %s1588_s23 }
 0x178   : > { %s2770_s19 = smov %s1576_s20  ;;  %20 = sbr.rel (!%p18_p8) target bundleno = 8 (0x8), region = 77 }
 0x17d   :  { %1282 = vsyncpa [#allocation5], 1 }
 0x17e   :  { %1284 = vsyncpa [#allocation5 + $0x1], 1 }
 0x17f   :  { %1285 = vsyncpa [#allocation6], 1 }
 0x180   :  { %1287 = vsyncpa [#allocation6 + $0x1], 1 }

</bundles_post_ra>
